<compile_context>
chip_gen: v6e
topology: v6e:2x2x1
jax: 0.10.0
libtpu: 0.0.40
codegen_flags: <defaults>
</compile_context>

<pallas_src>
import math
import numpy as np
import jax
import jax.numpy as jnp
from jax import lax
from jax.experimental import pallas as pl
from jax.experimental.pallas import tpu as pltpu

# synthetic cfg.dilation: square all-ones structuring elements 3x3/5x5/7x7/9x9
DILATION_SIZES = (3, 5, 7, 9)


def _gaussian_kernel1d(ksize, sigma):
    x = np.arange(ksize, dtype=np.float64) - ksize // 2
    g = np.exp(-x * x / (2.0 * sigma * sigma))
    return g / g.sum()


_G1 = _gaussian_kernel1d(5, 1.0)                     # separable 5-tap gaussian
TAN_22_5 = math.tan(math.radians(22.5))
TAN_67_5 = math.tan(math.radians(67.5))


def _ru(v, m):
    return ((v + m - 1) // m) * m


# ------------------------------------------------------------------ kernel ---
def _make_canny_tile_kernel(H, W, TH, nT, WIN, WO, WA):
    """Row-tiled fused canny kernel.

    Per tile t the scratch holds (in turn) the grayscale, the blurred image,
    the magnitude and the NMS/dilation carrier for image rows
    [t*TH - 8, t*TH + TH + 8) (local buffer row r <-> image row t*TH + r - 8).
    """
    HB = TH + 12                      # blurred rows per tile
    HS = TH + 10                      # sobel / magnitude rows
    HC = TH + 8                       # NMS / dilation-carrier rows
    g0, g1, g2 = float(_G1[0]), float(_G1[1]), float(_G1[2])

    # static: the bottom replicate row (image row H) can fall into the last
    # tile and, when the last tile has <= 5 valid rows, also the one before.
    row_h_last = H - (nT - 1) * TH + 6
    row_h_prev = H - (nT - 2) * TH + 6 if nT >= 2 else None
    need_prev_fix = nT >= 2 and row_h_prev <= HB - 1

    def kernel(xc_ref, xh_ref, e_ref, d1_ref, d2_ref, d3_ref, d4_ref, pad_ref):
        t = pl.program_id(1)
        s = t * TH                                   # first output row (image)

        # ---- 1) BGR -> RGB -> grayscale over core + halo rows ---------------
        pad_ref[0:TH, 0:WIN] = (0.299 * xc_ref[2] + 0.587 * xc_ref[1]
                                + 0.114 * xc_ref[0])
        pad_ref[TH:TH + 16, 0:WIN] = (0.299 * xh_ref[2] + 0.587 * xh_ref[1]
                                      + 0.114 * xh_ref[0])
        if WIN < WA:          # keep the spare lane stripe deterministic/finite
            pad_ref[0:TH + 16, WIN:WA] = jnp.zeros((TH + 16, WA - WIN),
                                                   jnp.float32)

        # ---- 2) separable symmetric 5x5 gaussian blur ------------------------
        tv = (g0 * (pad_ref[0:HB, :] + pad_ref[4:4 + HB, :])
              + g1 * (pad_ref[1:1 + HB, :] + pad_ref[3:3 + HB, :])
              + g2 * pad_ref[2:2 + HB, :])
        bl = (g0 * (tv[:, 0:WO] + tv[:, 4:4 + WO])
              + g1 * (tv[:, 1:1 + WO] + tv[:, 3:3 + WO])
              + g2 * tv[:, 2:2 + WO])
        # blurred stored at column offset 1 (replicate column ring for sobel)
        pad_ref[0:HB, 1:1 + WO] = bl
        pad_ref[0:HB, 0:1] = pad_ref[0:HB, 1:2]                # left  replicate
        pad_ref[0:HB, W + 1:W + 2] = pad_ref[0:HB, W:W + 1]    # right replicate

        # replicate rows at the true image boundary (sobel row halo)
        @pl.when(t == 0)
        def _():                                   # blurred row -1 := row 0
            pad_ref[5:6, :] = pad_ref[6:7, :]

        @pl.when(t == nT - 1)
        def _():                                   # blurred row H := row H-1
            pad_ref[row_h_last:row_h_last + 1, :] = \
                pad_ref[row_h_last - 1:row_h_last, :]

        if need_prev_fix:
            @pl.when(t == nT - 2)
            def _():
                pad_ref[row_h_prev:row_h_prev + 1, :] = \
                    pad_ref[row_h_prev - 1:row_h_prev, :]

        # ---- 3) separable sobel gradients + magnitude -------------------------
        r0 = pad_ref[0:HS, :]
        r1 = pad_ref[1:1 + HS, :]
        r2 = pad_ref[2:2 + HS, :]
        sv = r0 + 2.0 * r1 + r2                    # [1,2,1] vertical smooth
        dv = r2 - r0                               # [-1,0,1] vertical diff
        gx = sv[:, 2:2 + WO] - sv[:, 0:WO]
        gy = dv[:, 0:WO] + 2.0 * dv[:, 1:1 + WO] + dv[:, 2:2 + WO]
        mag = jnp.sqrt(gx * gx + gy * gy + 1e-6)

        # zero the magnitude outside the true image (kornia zero-pad for NMS;
        # the resulting zero NMS halo is equivalent to the -1e4 geodesic border
        # of the dilation because NMS >= 0 everywhere).
        row_i = lax.broadcasted_iota(jnp.int32, (HS, 1), 0)
        col_i = lax.broadcasted_iota(jnp.int32, (1, WO), 1)
        in_img = jnp.logical_and(
            jnp.logical_and(row_i >= 5 - s, row_i < (H + 5) - s),
            col_i < W)
        magm = jnp.where(in_img, mag, 0.0)

        # ring-only fills (no full-buffer re-initialisation)
        zc = jnp.zeros((HS, 1), jnp.float32)
        pad_ref[0:HS, 0:1] = zc
        pad_ref[0:HS, W + 1:W + 2] = zc
        if WO != W:
            pad_ref[0:HS, WO + 1:WO + 2] = zc
        pad_ref[0:HS, 1:1 + WO] = magm

        # ---- 4) non-maximum suppression ---------------------------------------
        gxc = gx[1:1 + HC, :]
        gyc = gy[1:1 + HC, :]
        axc = jnp.abs(gxc)
        ayc = jnp.abs(gyc)
        horiz = ayc <= TAN_22_5 * axc                     # octants {0,4}
        vert = ayc > TAN_67_5 * axc                       # octants {2,6}
        diag_main = gxc * gyc >= 0.0                      # only consulted when
                                                          # gx != 0 and gy != 0

        center = pad_ref[1:1 + HC, 1:1 + WO]
        nb = jnp.maximum(pad_ref[0:HC, 2:2 + WO],         # anti-diag pair
                         pad_ref[2:2 + HC, 0:WO])
        nb = jnp.where(diag_main,
                       jnp.maximum(pad_ref[0:HC, 0:WO],
                                   pad_ref[2:2 + HC, 2:2 + WO]),
                       nb)
        nb = jnp.where(vert,
                       jnp.maximum(pad_ref[0:HC, 1:1 + WO],
                                   pad_ref[2:2 + HC, 1:1 + WO]),
                       nb)
        nb = jnp.where(horiz,
                       jnp.maximum(pad_ref[1:1 + HC, 0:WO],
                                   pad_ref[1:1 + HC, 2:2 + WO]),
                       nb)
        nms = jnp.where(center > nb, center, 0.0)          # == canny()[0]
        e_ref[...] = nms[4:4 + TH, :]

        # ---- 5) dilation cascade: 3x3 -> 5x5 -> 7x7 -> 9x9 --------------------
        pad_ref[0:HC, 1:1 + WO] = nms
        out_refs = (d1_ref, d2_ref, d3_ref, d4_ref)
        for si in range(len(DILATION_SIZES)):
            lo = si + 1
            h = HC - 2 * lo
            vmax = jnp.maximum(
                jnp.maximum(pad_ref[lo - 1:lo - 1 + h, :],
                            pad_ref[lo:lo + h, :]),
                pad_ref[lo + 1:lo + 1 + h, :])
            cur = jnp.maximum(jnp.maximum(vmax[:, 0:WO], vmax[:, 1:1 + WO]),
                              vmax[:, 2:2 + WO])
            out_refs[si][...] = cur[4 - lo:4 - lo + TH, :]
            if si < len(DILATION_SIZES) - 1:
                pad_ref[lo:lo + h, 1:1 + WO] = cur

    return kernel


# ----------------------------------------------------------------- wrapper ---
def canny_edge_forward(x):
    """x: (B, 3, H, W) float32 BGR image batch (NCHW)."""
    x = x.astype(jnp.float32)
    B, C, H, W = x.shape
    assert C == 3

    WO = _ru(W, 128)                 # lane-aligned output width
    WIN = _ru(W + 4, 128)            # input block width (incl. reflect-2 pad)
    WA = WO + 128                    # scratch width (room for column halos)

    def vmem_estimate(th):
        blk_in = 3 * th * WIN * 4
        blk_halo = 3 * 16 * WIN * 4
        blk_out = 5 * th * WO * 4
        scratch = (th + 16) * WA * 4
        temps = 8 * (th + 16) * WA * 4           # live full-tile f32 slabs
        return 2 * (blk_in + blk_halo + blk_out) + scratch + temps

    # row-tile height: largest multiple of 16 (<=256) that fits the budget
    TH = min(256, _ru(H, 16))
    while TH > 16 and vmem_estimate(TH) > 32 * 1024 * 1024:
        TH = max(16, ((TH // 2) // 16) * 16)
    HP = _ru(H, TH)
    nT = HP // TH
    HIN = HP + 16

    # single wrapper-side pad: reflect(2) for the gaussian, then zero-extend to
    # the tiled layout (6 extra rows on top so tile t's rows start at t*TH).
    xp = jnp.pad(x, ((0, 0), (0, 0), (2, 2), (2, 2)), mode="reflect")
    xp = jnp.pad(xp, ((0, 0), (0, 0), (6, HIN - 6 - (H + 4)),
                      (0, WIN - (W + 4))))

    kernel = _make_canny_tile_kernel(H, W, TH, nT, WIN, WO, WA)

    out_shape = tuple(jax.ShapeDtypeStruct((B, HP, WO), jnp.float32)
                      for _ in range(5))
    out_spec = pl.BlockSpec((None, TH, WO), lambda b, t: (b, t, 0))
    halo_blk = TH // 16

    est = vmem_estimate(TH)
    vmem_limit = int(min(56 * 2**20, max(32 * 2**20, int(1.5 * est))))
    cost = pl.CostEstimate(
        flops=80 * B * HP * WO,
        transcendentals=B * HP * WO,
        bytes_accessed=int(xp.size) * 4 + 5 * B * HP * WO * 4)

    outs = pl.pallas_call(
        kernel,
        out_shape=out_shape,
        grid=(B, nT),
        in_specs=[
            # core rows of the tile
            pl.BlockSpec((None, 3, TH, WIN), lambda b, t: (b, 0, t, 0)),
            # 16 halo rows (same array, next 16-row block) - auto-pipelined
            pl.BlockSpec((None, 3, 16, WIN),
                         lambda b, t: (b, 0, t * halo_blk + halo_blk, 0)),
        ],
        out_specs=tuple(out_spec for _ in range(5)),
        scratch_shapes=[pltpu.VMEM((TH + 16, WA), jnp.float32)],
        compiler_params=pltpu.CompilerParams(
            dimension_semantics=("parallel", "parallel"),
            vmem_limit_bytes=vmem_limit),
        cost_estimate=cost,
    )(xp, xp)

    # crop the lane-dense outputs back to (B, 1, H, W) (skipped when aligned)
    if H != HP or W != WO:
        outs = tuple(o[:, :H, :W] for o in outs)
    edge, d1, d2, d3, d4 = (o[:, None, :, :] for o in outs)

    # TODO(synk): RandomChannelShuffle(p=0.75) / ColorJitter are stochastic
    # kornia augmentations; the deterministic identity branch is returned for
    # x_out5 (the p-miss sample).
    x_out5 = x
    return (edge, d1, d2, d3, d4, x_out5)


# -------------------------------------------------------------------- main ---
def _check(outs, B, H, W):
    edge, d1, d2, d3, d4, x5 = outs
    assert edge.shape == (B, 1, H, W)
    for o in (d1, d2, d3, d4):
        assert o.shape == (B, 1, H, W)
    assert x5.shape == (B, 3, H, W)
    for o in (edge, d1, d2, d3, d4, x5):
        assert bool(jnp.all(jnp.isfinite(o)))
    # exact invariants of the dilation cascade (no float-tie flakiness)
    assert bool(jnp.all(edge >= 0.0))
    assert bool(jnp.all(d1 >= edge))
    assert bool(jnp.all(d2 >= d1))
    assert bool(jnp.all(d3 >= d2))
    assert bool(jnp.all(d4 >= d3))


if __name__ == "__main__":
    key = jax.random.PRNGKey(0)

    # small aligned-ish case (single row tile)
    x = jax.random.uniform(key, (2, 3, 16, 16), dtype=jnp.float32)
    outs = jax.jit(canny_edge_forward)(x)
    outs = jax.block_until_ready(outs)
    _check(outs, 2, 16, 16)

    # unaligned multi-row-tile case (exercises halos + boundary fixes)
    k2 = jax.random.fold_in(key, 1)
    x2 = jax.random.uniform(k2, (1, 3, 258, 100), dtype=jnp.float32)
    outs2 = jax.jit(canny_edge_forward)(x2)
    outs2 = jax.block_until_ready(outs2)
    _check(outs2, 1, 258, 100)

    print("KERNEL_OK")
</pallas_src>

<mosaic_0001>
module attributes {stable_mosaic.version = 11 : i64} {
  func.func @kernel(%arg0: i32, %arg1: i32, %arg2: memref<1x3x16x128xf32, #tpu.memory_space<vmem>>, %arg3: memref<1x3x16x128xf32, #tpu.memory_space<vmem>>, %arg4: memref<1x16x128xf32, #tpu.memory_space<vmem>>, %arg5: memref<1x16x128xf32, #tpu.memory_space<vmem>>, %arg6: memref<1x16x128xf32, #tpu.memory_space<vmem>>, %arg7: memref<1x16x128xf32, #tpu.memory_space<vmem>>, %arg8: memref<1x16x128xf32, #tpu.memory_space<vmem>>, %arg9: memref<32x256xf32, #tpu.memory_space<vmem>>) attributes {dimension_semantics = [#tpu.dimension_semantics<parallel>, #tpu.dimension_semantics<parallel>], iteration_bounds = array<i64: 2, 1>, scalar_prefetch = 0 : i64, scratch_operands = 1 : i64, tpu.core_type = #tpu.core_type<tc>, window_params = [{transform_indices = @transform_0, window_bounds = array<i64: 1, 3, 16, 128>}, {transform_indices = @transform_1, window_bounds = array<i64: 1, 3, 16, 128>}, {transform_indices = @transform_2, window_bounds = array<i64: 1, 16, 128>}, {transform_indices = @transform_3, window_bounds = array<i64: 1, 16, 128>}, {transform_indices = @transform_4, window_bounds = array<i64: 1, 16, 128>}, {transform_indices = @transform_5, window_bounds = array<i64: 1, 16, 128>}, {transform_indices = @transform_6, window_bounds = array<i64: 1, 16, 128>}]} {
    %c16_i32 = arith.constant 16 : i32
    %0 = arith.muli %arg1, %c16_i32 : i32
    %c0 = arith.constant 0 : index
    %c2 = arith.constant 2 : index
    %c0_0 = arith.constant 0 : index
    %c0_1 = arith.constant 0 : index
    %1 = vector.load %arg2[%c0, %c2, %c0_0, %c0_1] : memref<1x3x16x128xf32, #tpu.memory_space<vmem>>, vector<1x1x16x128xf32>
    %2 = vector.shape_cast %1 : vector<1x1x16x128xf32> to vector<16x128xf32>
    %cst = arith.constant 2.990000e-01 : f32
    %3 = vector.broadcast %cst : f32 to vector<16x128xf32>
    %4 = arith.mulf %3, %2 : vector<16x128xf32>
    %c0_2 = arith.constant 0 : index
    %c1 = arith.constant 1 : index
    %c0_3 = arith.constant 0 : index
    %c0_4 = arith.constant 0 : index
    %5 = vector.load %arg2[%c0_2, %c1, %c0_3, %c0_4] : memref<1x3x16x128xf32, #tpu.memory_space<vmem>>, vector<1x1x16x128xf32>
    %6 = vector.shape_cast %5 : vector<1x1x16x128xf32> to vector<16x128xf32>
    %cst_5 = arith.constant 5.870000e-01 : f32
    %7 = vector.broadcast %cst_5 : f32 to vector<16x128xf32>
    %8 = arith.mulf %7, %6 : vector<16x128xf32>
    %9 = arith.addf %4, %8 : vector<16x128xf32>
    %c0_6 = arith.constant 0 : index
    %c0_7 = arith.constant 0 : index
    %c0_8 = arith.constant 0 : index
    %c0_9 = arith.constant 0 : index
    %10 = vector.load %arg2[%c0_6, %c0_7, %c0_8, %c0_9] : memref<1x3x16x128xf32, #tpu.memory_space<vmem>>, vector<1x1x16x128xf32>
    %11 = vector.shape_cast %10 : vector<1x1x16x128xf32> to vector<16x128xf32>
    %cst_10 = arith.constant 1.140000e-01 : f32
    %12 = vector.broadcast %cst_10 : f32 to vector<16x128xf32>
    %13 = arith.mulf %12, %11 : vector<16x128xf32>
    %14 = arith.addf %9, %13 : vector<16x128xf32>
    %c0_11 = arith.constant 0 : index
    %c0_12 = arith.constant 0 : index
    %15 = vector.load %arg9[%c0_11, %c0_12] : memref<32x256xf32, #tpu.memory_space<vmem>>, vector<16x128xf32>
    tpu.vector_store %arg9[%c0_11, %c0_12], %14 {strides = array<i32>} : memref<32x256xf32, #tpu.memory_space<vmem>>, vector<16x128xf32>,
    %c0_13 = arith.constant 0 : index
    %c2_14 = arith.constant 2 : index
    %c0_15 = arith.constant 0 : index
    %c0_16 = arith.constant 0 : index
    %16 = vector.load %arg3[%c0_13, %c2_14, %c0_15, %c0_16] : memref<1x3x16x128xf32, #tpu.memory_space<vmem>>, vector<1x1x16x128xf32>
    %17 = vector.shape_cast %16 : vector<1x1x16x128xf32> to vector<16x128xf32>
    %cst_17 = arith.constant 2.990000e-01 : f32
    %18 = vector.broadcast %cst_17 : f32 to vector<16x128xf32>
    %19 = arith.mulf %18, %17 : vector<16x128xf32>
    %c0_18 = arith.constant 0 : index
    %c1_19 = arith.constant 1 : index
    %c0_20 = arith.constant 0 : index
    %c0_21 = arith.constant 0 : index
    %20 = vector.load %arg3[%c0_18, %c1_19, %c0_20, %c0_21] : memref<1x3x16x128xf32, #tpu.memory_space<vmem>>, vector<1x1x16x128xf32>
    %21 = vector.shape_cast %20 : vector<1x1x16x128xf32> to vector<16x128xf32>
    %cst_22 = arith.constant 5.870000e-01 : f32
    %22 = vector.broadcast %cst_22 : f32 to vector<16x128xf32>
    %23 = arith.mulf %22, %21 : vector<16x128xf32>
    %24 = arith.addf %19, %23 : vector<16x128xf32>
    %c0_23 = arith.constant 0 : index
    %c0_24 = arith.constant 0 : index
    %c0_25 = arith.constant 0 : index
    %c0_26 = arith.constant 0 : index
    %25 = vector.load %arg3[%c0_23, %c0_24, %c0_25, %c0_26] : memref<1x3x16x128xf32, #tpu.memory_space<vmem>>, vector<1x1x16x128xf32>
    %26 = vector.shape_cast %25 : vector<1x1x16x128xf32> to vector<16x128xf32>
    %cst_27 = arith.constant 1.140000e-01 : f32
    %27 = vector.broadcast %cst_27 : f32 to vector<16x128xf32>
    %28 = arith.mulf %27, %26 : vector<16x128xf32>
    %29 = arith.addf %24, %28 : vector<16x128xf32>
    %c16 = arith.constant 16 : index
    %c0_28 = arith.constant 0 : index
    %30 = vector.load %arg9[%c16, %c0_28] : memref<32x256xf32, #tpu.memory_space<vmem>>, vector<16x128xf32>
    tpu.vector_store %arg9[%c16, %c0_28], %29 {strides = array<i32>} : memref<32x256xf32, #tpu.memory_space<vmem>>, vector<16x128xf32>,
    %cst_29 = arith.constant 0.000000e+00 : f32
    %31 = vector.broadcast %cst_29 : f32 to vector<32x128xf32>
    %c0_30 = arith.constant 0 : index
    %c128 = arith.constant 128 : index
    %32 = vector.load %arg9[%c0_30, %c128] : memref<32x256xf32, #tpu.memory_space<vmem>>, vector<32x128xf32>
    tpu.vector_store %arg9[%c0_30, %c128], %31 {strides = array<i32>} : memref<32x256xf32, #tpu.memory_space<vmem>>, vector<32x128xf32>,
    %c0_31 = arith.constant 0 : index
    %c0_32 = arith.constant 0 : index
    %33 = vector.load %arg9[%c0_31, %c0_32] : memref<32x256xf32, #tpu.memory_space<vmem>>, vector<28x256xf32>
    %c4 = arith.constant 4 : index
    %c0_33 = arith.constant 0 : index
    %34 = vector.load %arg9[%c4, %c0_33] : memref<32x256xf32, #tpu.memory_space<vmem>>, vector<28x256xf32>
    %35 = arith.addf %33, %34 : vector<28x256xf32>
    %cst_34 = arith.constant 0.054488685 : f32
    %36 = vector.broadcast %cst_34 : f32 to vector<28x256xf32>
    %37 = arith.mulf %36, %35 : vector<28x256xf32>
    %c1_35 = arith.constant 1 : index
    %c0_36 = arith.constant 0 : index
    %38 = vector.load %arg9[%c1_35, %c0_36] : memref<32x256xf32, #tpu.memory_space<vmem>>, vector<28x256xf32>
    %c3 = arith.constant 3 : index
    %c0_37 = arith.constant 0 : index
    %39 = vector.load %arg9[%c3, %c0_37] : memref<32x256xf32, #tpu.memory_space<vmem>>, vector<28x256xf32>
    %40 = arith.addf %38, %39 : vector<28x256xf32>
    %cst_38 = arith.constant 0.244201347 : f32
    %41 = vector.broadcast %cst_38 : f32 to vector<28x256xf32>
    %42 = arith.mulf %41, %40 : vector<28x256xf32>
    %43 = arith.addf %37, %42 : vector<28x256xf32>
    %c2_39 = arith.constant 2 : index
    %c0_40 = arith.constant 0 : index
    %44 = vector.load %arg9[%c2_39, %c0_40] : memref<32x256xf32, #tpu.memory_space<vmem>>, vector<28x256xf32>
    %cst_41 = arith.constant 0.402619958 : f32
    %45 = vector.broadcast %cst_41 : f32 to vector<28x256xf32>
    %46 = arith.mulf %45, %44 : vector<28x256xf32>
    %47 = arith.addf %43, %46 : vector<28x256xf32>
    %48 = vector.extract_strided_slice %47 {offsets = [0, 0], sizes = [28, 128], strides = [1, 1]} : vector<28x256xf32> to vector<28x128xf32>
    %49 = vector.extract_strided_slice %47 {offsets = [0, 4], sizes = [28, 128], strides = [1, 1]} : vector<28x256xf32> to vector<28x128xf32>
    %50 = arith.addf %48, %49 : vector<28x128xf32>
    %cst_42 = arith.constant 0.054488685 : f32
    %51 = vector.broadcast %cst_42 : f32 to vector<28x128xf32>
    %52 = arith.mulf %51, %50 : vector<28x128xf32>
    %53 = vector.extract_strided_slice %47 {offsets = [0, 1], sizes = [28, 128], strides = [1, 1]} : vector<28x256xf32> to vector<28x128xf32>
    %54 = vector.extract_strided_slice %47 {offsets = [0, 3], sizes = [28, 128], strides = [1, 1]} : vector<28x256xf32> to vector<28x128xf32>
    %55 = arith.addf %53, %54 : vector<28x128xf32>
    %cst_43 = arith.constant 0.244201347 : f32
    %56 = vector.broadcast %cst_43 : f32 to vector<28x128xf32>
    %57 = arith.mulf %56, %55 : vector<28x128xf32>
    %58 = arith.addf %52, %57 : vector<28x128xf32>
    %59 = vector.extract_strided_slice %47 {offsets = [0, 2], sizes = [28, 128], strides = [1, 1]} : vector<28x256xf32> to vector<28x128xf32>
    %cst_44 = arith.constant 0.402619958 : f32
    %60 = vector.broadcast %cst_44 : f32 to vector<28x128xf32>
    %61 = arith.mulf %60, %59 : vector<28x128xf32>
    %62 = arith.addf %58, %61 : vector<28x128xf32>
    %c0_45 = arith.constant 0 : index
    %c1_46 = arith.constant 1 : index
    %63 = vector.load %arg9[%c0_45, %c1_46] : memref<32x256xf32, #tpu.memory_space<vmem>>, vector<28x128xf32>
    tpu.vector_store %arg9[%c0_45, %c1_46], %62 {strides = array<i32>} : memref<32x256xf32, #tpu.memory_space<vmem>>, vector<28x128xf32>,
    %c0_47 = arith.constant 0 : index
    %c1_48 = arith.constant 1 : index
    %64 = vector.load %arg9[%c0_47, %c1_48] : memref<32x256xf32, #tpu.memory_space<vmem>>, vector<28x1xf32>
    %c0_49 = arith.constant 0 : index
    %c0_50 = arith.constant 0 : index
    %65 = vector.load %arg9[%c0_49, %c0_50] : memref<32x256xf32, #tpu.memory_space<vmem>>, vector<28x1xf32>
    tpu.vector_store %arg9[%c0_49, %c0_50], %64 {strides = array<i32>} : memref<32x256xf32, #tpu.memory_space<vmem>>, vector<28x1xf32>,
    %c0_51 = arith.constant 0 : index
    %c16_52 = arith.constant 16 : index
    %66 = vector.load %arg9[%c0_51, %c16_52] : memref<32x256xf32, #tpu.memory_space<vmem>>, vector<28x1xf32>
    %c0_53 = arith.constant 0 : index
    %c17 = arith.constant 17 : index
    %67 = vector.load %arg9[%c0_53, %c17] : memref<32x256xf32, #tpu.memory_space<vmem>>, vector<28x1xf32>
    tpu.vector_store %arg9[%c0_53, %c17], %66 {strides = array<i32>} : memref<32x256xf32, #tpu.memory_space<vmem>>, vector<28x1xf32>,
    %c0_i32 = arith.constant 0 : i32
    %68 = arith.cmpi eq, %arg1, %c0_i32 : i32
    %69 = arith.extui %68 : i1 to i32
    %c0_i32_54 = arith.constant 0 : i32
    %70 = arith.cmpi ne, %69, %c0_i32_54 : i32
    scf.if %70 {
      %c6 = arith.constant 6 : index
      %c0_144 = arith.constant 0 : index
      %214 = vector.load %arg9[%c6, %c0_144] : memref<32x256xf32, #tpu.memory_space<vmem>>, vector<1x256xf32>
      %c5_145 = arith.constant 5 : index
      %c0_146 = arith.constant 0 : index
      %215 = vector.load %arg9[%c5_145, %c0_146] : memref<32x256xf32, #tpu.memory_space<vmem>>, vector<1x256xf32>
      tpu.vector_store %arg9[%c5_145, %c0_146], %214 {strides = array<i32>} : memref<32x256xf32, #tpu.memory_space<vmem>>, vector<1x256xf32>,
    } else {
    }
    %c0_i32_55 = arith.constant 0 : i32
    %71 = arith.cmpi eq, %arg1, %c0_i32_55 : i32
    %72 = arith.extui %71 : i1 to i32
    %c0_i32_56 = arith.constant 0 : i32
    %73 = arith.cmpi ne, %72, %c0_i32_56 : i32
    scf.if %73 {
      %c21 = arith.constant 21 : index
      %c0_144 = arith.constant 0 : index
      %214 = vector.load %arg9[%c21, %c0_144] : memref<32x256xf32, #tpu.memory_space<vmem>>, vector<1x256xf32>
      %c22 = arith.constant 22 : index
      %c0_145 = arith.constant 0 : index
      %215 = vector.load %arg9[%c22, %c0_145] : memref<32x256xf32, #tpu.memory_space<vmem>>, vector<1x256xf32>
      tpu.vector_store %arg9[%c22, %c0_145], %214 {strides = array<i32>} : memref<32x256xf32, #tpu.memory_space<vmem>>, vector<1x256xf32>,
    } else {
    }
    %c0_57 = arith.constant 0 : index
    %c0_58 = arith.constant 0 : index
    %74 = vector.load %arg9[%c0_57, %c0_58] : memref<32x256xf32, #tpu.memory_space<vmem>>, vector<26x256xf32>
    %c1_59 = arith.constant 1 : index
    %c0_60 = arith.constant 0 : index
    %75 = vector.load %arg9[%c1_59, %c0_60] : memref<32x256xf32, #tpu.memory_space<vmem>>, vector<26x256xf32>
    %c2_61 = arith.constant 2 : index
    %c0_62 = arith.constant 0 : index
    %76 = vector.load %arg9[%c2_61, %c0_62] : memref<32x256xf32, #tpu.memory_space<vmem>>, vector<26x256xf32>
    %cst_63 = arith.constant 2.000000e+00 : f32
    %77 = vector.broadcast %cst_63 : f32 to vector<26x256xf32>
    %78 = arith.mulf %77, %75 : vector<26x256xf32>
    %79 = arith.addf %74, %78 : vector<26x256xf32>
    %80 = arith.addf %79, %76 : vector<26x256xf32>
    %81 = arith.subf %76, %74 : vector<26x256xf32>
    %82 = vector.extract_strided_slice %80 {offsets = [0, 2], sizes = [26, 128], strides = [1, 1]} : vector<26x256xf32> to vector<26x128xf32>
    %83 = vector.extract_strided_slice %80 {offsets = [0, 0], sizes = [26, 128], strides = [1, 1]} : vector<26x256xf32> to vector<26x128xf32>
    %84 = arith.subf %82, %83 : vector<26x128xf32>
    %85 = vector.extract_strided_slice %81 {offsets = [0, 0], sizes = [26, 128], strides = [1, 1]} : vector<26x256xf32> to vector<26x128xf32>
    %86 = vector.extract_strided_slice %81 {offsets = [0, 1], sizes = [26, 128], strides = [1, 1]} : vector<26x256xf32> to vector<26x128xf32>
    %cst_64 = arith.constant 2.000000e+00 : f32
    %87 = vector.broadcast %cst_64 : f32 to vector<26x128xf32>
    %88 = arith.mulf %87, %86 : vector<26x128xf32>
    %89 = arith.addf %85, %88 : vector<26x128xf32>
    %90 = vector.extract_strided_slice %81 {offsets = [0, 2], sizes = [26, 128], strides = [1, 1]} : vector<26x256xf32> to vector<26x128xf32>
    %91 = arith.addf %89, %90 : vector<26x128xf32>
    %92 = arith.mulf %84, %84 : vector<26x128xf32>
    %93 = arith.mulf %91, %91 : vector<26x128xf32>
    %94 = arith.addf %92, %93 : vector<26x128xf32>
    %cst_65 = arith.constant 9.99999997E-7 : f32
    %95 = vector.broadcast %cst_65 : f32 to vector<26x128xf32>
    %96 = arith.addf %94, %95 : vector<26x128xf32>
    %97 = math.sqrt %96 : vector<26x128xf32>
    %98 = tpu.iota {dimensions = array<i32: 0>} : vector<26x1xi32>
    %99 = tpu.iota {dimensions = array<i32: 1>} : vector<1x128xi32>
    %c5_i32 = arith.constant 5 : i32
    %100 = arith.subi %c5_i32, %0 : i32
    %101 = vector.broadcast %100 : i32 to vector<26x1xi32>
    %102 = arith.cmpi sge, %98, %101 : vector<26x1xi32>
    %c21_i32 = arith.constant 21 : i32
    %103 = arith.subi %c21_i32, %0 : i32
    %104 = vector.broadcast %103 : i32 to vector<26x1xi32>
    %105 = arith.cmpi slt, %98, %104 : vector<26x1xi32>
    %106 = arith.andi %102, %105 : vector<26x1xi1>
    %c16_i32_66 = arith.constant 16 : i32
    %107 = vector.broadcast %c16_i32_66 : i32 to vector<1x128xi32>
    %108 = arith.cmpi slt, %99, %107 : vector<1x128xi32>
    %109 = vector.broadcast %106 : vector<26x1xi1> to vector<26x128xi1>
    %110 = vector.broadcast %108 : vector<1x128xi1> to vector<26x128xi1>
    %111 = arith.andi %109, %110 : vector<26x128xi1>
    %cst_67 = arith.constant 0.000000e+00 : f32
    %112 = vector.broadcast %cst_67 : f32 to vector<26x128xf32>
    %113 = arith.select %111, %97, %112 : vector<26x128xi1>, vector<26x128xf32>
    %cst_68 = arith.constant 0.000000e+00 : f32
    %114 = vector.broadcast %cst_68 : f32 to vector<26x1xf32>
    %c0_69 = arith.constant 0 : index
    %c0_70 = arith.constant 0 : index
    %115 = vector.load %arg9[%c0_69, %c0_70] : memref<32x256xf32, #tpu.memory_space<vmem>>, vector<26x1xf32>
    tpu.vector_store %arg9[%c0_69, %c0_70], %114 {strides = array<i32>} : memref<32x256xf32, #tpu.memory_space<vmem>>, vector<26x1xf32>,
    %c0_71 = arith.constant 0 : index
    %c17_72 = arith.constant 17 : index
    %116 = vector.load %arg9[%c0_71, %c17_72] : memref<32x256xf32, #tpu.memory_space<vmem>>, vector<26x1xf32>
    tpu.vector_store %arg9[%c0_71, %c17_72], %114 {strides = array<i32>} : memref<32x256xf32, #tpu.memory_space<vmem>>, vector<26x1xf32>,
    %c0_73 = arith.constant 0 : index
    %c129 = arith.constant 129 : index
    %117 = vector.load %arg9[%c0_73, %c129] : memref<32x256xf32, #tpu.memory_space<vmem>>, vector<26x1xf32>
    tpu.vector_store %arg9[%c0_73, %c129], %114 {strides = array<i32>} : memref<32x256xf32, #tpu.memory_space<vmem>>, vector<26x1xf32>,
    %c0_74 = arith.constant 0 : index
    %c1_75 = arith.constant 1 : index
    %118 = vector.load %arg9[%c0_74, %c1_75] : memref<32x256xf32, #tpu.memory_space<vmem>>, vector<26x128xf32>
    tpu.vector_store %arg9[%c0_74, %c1_75], %113 {strides = array<i32>} : memref<32x256xf32, #tpu.memory_space<vmem>>, vector<26x128xf32>,
    %119 = vector.extract_strided_slice %84 {offsets = [1, 0], sizes = [24, 128], strides = [1, 1]} : vector<26x128xf32> to vector<24x128xf32>
    %120 = vector.extract_strided_slice %91 {offsets = [1, 0], sizes = [24, 128], strides = [1, 1]} : vector<26x128xf32> to vector<24x128xf32>
    %121 = math.absf %119 : vector<24x128xf32>
    %122 = math.absf %120 : vector<24x128xf32>
    %cst_76 = arith.constant 0.414213568 : f32
    %123 = vector.broadcast %cst_76 : f32 to vector<24x128xf32>
    %124 = arith.mulf %123, %121 : vector<24x128xf32>
    %125 = arith.cmpf ole, %122, %124 : vector<24x128xf32>
    %cst_77 = arith.constant 2.41421366 : f32
    %126 = vector.broadcast %cst_77 : f32 to vector<24x128xf32>
    %127 = arith.mulf %126, %121 : vector<24x128xf32>
    %128 = arith.cmpf ogt, %122, %127 : vector<24x128xf32>
    %129 = arith.mulf %119, %120 : vector<24x128xf32>
    %cst_78 = arith.constant 0.000000e+00 : f32
    %130 = vector.broadcast %cst_78 : f32 to vector<24x128xf32>
    %131 = arith.cmpf oge, %129, %130 : vector<24x128xf32>
    %c1_79 = arith.constant 1 : index
    %c1_80 = arith.constant 1 : index
    %132 = vector.load %arg9[%c1_79, %c1_80] : memref<32x256xf32, #tpu.memory_space<vmem>>, vector<24x128xf32>
    %c0_81 = arith.constant 0 : index
    %c2_82 = arith.constant 2 : index
    %133 = vector.load %arg9[%c0_81, %c2_82] : memref<32x256xf32, #tpu.memory_space<vmem>>, vector<24x128xf32>
    %c2_83 = arith.constant 2 : index
    %c0_84 = arith.constant 0 : index
    %134 = vector.load %arg9[%c2_83, %c0_84] : memref<32x256xf32, #tpu.memory_space<vmem>>, vector<24x128xf32>
    %135 = arith.maximumf %133, %134 : vector<24x128xf32>
    %c0_85 = arith.constant 0 : index
    %c0_86 = arith.constant 0 : index
    %136 = vector.load %arg9[%c0_85, %c0_86] : memref<32x256xf32, #tpu.memory_space<vmem>>, vector<24x128xf32>
    %c2_87 = arith.constant 2 : index
    %c2_88 = arith.constant 2 : index
    %137 = vector.load %arg9[%c2_87, %c2_88] : memref<32x256xf32, #tpu.memory_space<vmem>>, vector<24x128xf32>
    %138 = arith.maximumf %136, %137 : vector<24x128xf32>
    %139 = arith.select %131, %138, %135 : vector<24x128xi1>, vector<24x128xf32>
    %c0_89 = arith.constant 0 : index
    %c1_90 = arith.constant 1 : index
    %140 = vector.load %arg9[%c0_89, %c1_90] : memref<32x256xf32, #tpu.memory_space<vmem>>, vector<24x128xf32>
    %c2_91 = arith.constant 2 : index
    %c1_92 = arith.constant 1 : index
    %141 = vector.load %arg9[%c2_91, %c1_92] : memref<32x256xf32, #tpu.memory_space<vmem>>, vector<24x128xf32>
    %142 = arith.maximumf %140, %141 : vector<24x128xf32>
    %143 = arith.select %128, %142, %139 : vector<24x128xi1>, vector<24x128xf32>
    %c1_93 = arith.constant 1 : index
    %c0_94 = arith.constant 0 : index
    %144 = vector.load %arg9[%c1_93, %c0_94] : memref<32x256xf32, #tpu.memory_space<vmem>>, vector<24x128xf32>
    %c1_95 = arith.constant 1 : index
    %c2_96 = arith.constant 2 : index
    %145 = vector.load %arg9[%c1_95, %c2_96] : memref<32x256xf32, #tpu.memory_space<vmem>>, vector<24x128xf32>
    %146 = arith.maximumf %144, %145 : vector<24x128xf32>
    %147 = arith.select %125, %146, %143 : vector<24x128xi1>, vector<24x128xf32>
    %148 = arith.cmpf ogt, %132, %147 : vector<24x128xf32>
    %cst_97 = arith.constant 0.000000e+00 : f32
    %149 = vector.broadcast %cst_97 : f32 to vector<24x128xf32>
    %150 = arith.select %148, %132, %149 : vector<24x128xi1>, vector<24x128xf32>
    %151 = vector.extract_strided_slice %150 {offsets = [4, 0], sizes = [16, 128], strides = [1, 1]} : vector<24x128xf32> to vector<16x128xf32>
    %c0_98 = arith.constant 0 : index
    %c0_99 = arith.constant 0 : index
    %c0_100 = arith.constant 0 : index
    %152 = vector.load %arg4[%c0_98, %c0_99, %c0_100] : memref<1x16x128xf32, #tpu.memory_space<vmem>>, vector<1x16x128xf32>
    %153 = vector.shape_cast %152 : vector<1x16x128xf32> to vector<16x128xf32>
    %154 = vector.shape_cast %151 : vector<16x128xf32> to vector<1x16x128xf32>
    tpu.vector_store %arg4[%c0_98, %c0_99, %c0_100], %154 {strides = array<i32>} : memref<1x16x128xf32, #tpu.memory_space<vmem>>, vector<1x16x128xf32>,
    %c0_101 = arith.constant 0 : index
    %c1_102 = arith.constant 1 : index
    %155 = vector.load %arg9[%c0_101, %c1_102] : memref<32x256xf32, #tpu.memory_space<vmem>>, vector<24x128xf32>
    tpu.vector_store %arg9[%c0_101, %c1_102], %150 {strides = array<i32>} : memref<32x256xf32, #tpu.memory_space<vmem>>, vector<24x128xf32>,
    %c0_103 = arith.constant 0 : index
    %c0_104 = arith.constant 0 : index
    %156 = vector.load %arg9[%c0_103, %c0_104] : memref<32x256xf32, #tpu.memory_space<vmem>>, vector<22x256xf32>
    %c1_105 = arith.constant 1 : index
    %c0_106 = arith.constant 0 : index
    %157 = vector.load %arg9[%c1_105, %c0_106] : memref<32x256xf32, #tpu.memory_space<vmem>>, vector<22x256xf32>
    %158 = arith.maximumf %156, %157 : vector<22x256xf32>
    %c2_107 = arith.constant 2 : index
    %c0_108 = arith.constant 0 : index
    %159 = vector.load %arg9[%c2_107, %c0_108] : memref<32x256xf32, #tpu.memory_space<vmem>>, vector<22x256xf32>
    %160 = arith.maximumf %158, %159 : vector<22x256xf32>
    %161 = vector.extract_strided_slice %160 {offsets = [0, 0], sizes = [22, 128], strides = [1, 1]} : vector<22x256xf32> to vector<22x128xf32>
    %162 = vector.extract_strided_slice %160 {offsets = [0, 1], sizes = [22, 128], strides = [1, 1]} : vector<22x256xf32> to vector<22x128xf32>
    %163 = arith.maximumf %161, %162 : vector<22x128xf32>
    %164 = vector.extract_strided_slice %160 {offsets = [0, 2], sizes = [22, 128], strides = [1, 1]} : vector<22x256xf32> to vector<22x128xf32>
    %165 = arith.maximumf %163, %164 : vector<22x128xf32>
    %166 = vector.extract_strided_slice %165 {offsets = [3, 0], sizes = [16, 128], strides = [1, 1]} : vector<22x128xf32> to vector<16x128xf32>
    %c0_109 = arith.constant 0 : index
    %c0_110 = arith.constant 0 : index
    %c0_111 = arith.constant 0 : index
    %167 = vector.load %arg5[%c0_109, %c0_110, %c0_111] : memref<1x16x128xf32, #tpu.memory_space<vmem>>, vector<1x16x128xf32>
    %168 = vector.shape_cast %167 : vector<1x16x128xf32> to vector<16x128xf32>
    %169 = vector.shape_cast %166 : vector<16x128xf32> to vector<1x16x128xf32>
    tpu.vector_store %arg5[%c0_109, %c0_110, %c0_111], %169 {strides = array<i32>} : memref<1x16x128xf32, #tpu.memory_space<vmem>>, vector<1x16x128xf32>,
    %c1_112 = arith.constant 1 : index
    %c1_113 = arith.constant 1 : index
    %170 = vector.load %arg9[%c1_112, %c1_113] : memref<32x256xf32, #tpu.memory_space<vmem>>, vector<22x128xf32>
    tpu.vector_store %arg9[%c1_112, %c1_113], %165 {strides = array<i32>} : memref<32x256xf32, #tpu.memory_space<vmem>>, vector<22x128xf32>,
    %c1_114 = arith.constant 1 : index
    %c0_115 = arith.constant 0 : index
    %171 = vector.load %arg9[%c1_114, %c0_115] : memref<32x256xf32, #tpu.memory_space<vmem>>, vector<20x256xf32>
    %c2_116 = arith.constant 2 : index
    %c0_117 = arith.constant 0 : index
    %172 = vector.load %arg9[%c2_116, %c0_117] : memref<32x256xf32, #tpu.memory_space<vmem>>, vector<20x256xf32>
    %173 = arith.maximumf %171, %172 : vector<20x256xf32>
    %c3_118 = arith.constant 3 : index
    %c0_119 = arith.constant 0 : index
    %174 = vector.load %arg9[%c3_118, %c0_119] : memref<32x256xf32, #tpu.memory_space<vmem>>, vector<20x256xf32>
    %175 = arith.maximumf %173, %174 : vector<20x256xf32>
    %176 = vector.extract_strided_slice %175 {offsets = [0, 0], sizes = [20, 128], strides = [1, 1]} : vector<20x256xf32> to vector<20x128xf32>
    %177 = vector.extract_strided_slice %175 {offsets = [0, 1], sizes = [20, 128], strides = [1, 1]} : vector<20x256xf32> to vector<20x128xf32>
    %178 = arith.maximumf %176, %177 : vector<20x128xf32>
    %179 = vector.extract_strided_slice %175 {offsets = [0, 2], sizes = [20, 128], strides = [1, 1]} : vector<20x256xf32> to vector<20x128xf32>
    %180 = arith.maximumf %178, %179 : vector<20x128xf32>
    %181 = vector.extract_strided_slice %180 {offsets = [2, 0], sizes = [16, 128], strides = [1, 1]} : vector<20x128xf32> to vector<16x128xf32>
    %c0_120 = arith.constant 0 : index
    %c0_121 = arith.constant 0 : index
    %c0_122 = arith.constant 0 : index
    %182 = vector.load %arg6[%c0_120, %c0_121, %c0_122] : memref<1x16x128xf32, #tpu.memory_space<vmem>>, vector<1x16x128xf32>
    %183 = vector.shape_cast %182 : vector<1x16x128xf32> to vector<16x128xf32>
    %184 = vector.shape_cast %181 : vector<16x128xf32> to vector<1x16x128xf32>
    tpu.vector_store %arg6[%c0_120, %c0_121, %c0_122], %184 {strides = array<i32>} : memref<1x16x128xf32, #tpu.memory_space<vmem>>, vector<1x16x128xf32>,
    %c2_123 = arith.constant 2 : index
    %c1_124 = arith.constant 1 : index
    %185 = vector.load %arg9[%c2_123, %c1_124] : memref<32x256xf32, #tpu.memory_space<vmem>>, vector<20x128xf32>
    tpu.vector_store %arg9[%c2_123, %c1_124], %180 {strides = array<i32>} : memref<32x256xf32, #tpu.memory_space<vmem>>, vector<20x128xf32>,
    %c2_125 = arith.constant 2 : index
    %c0_126 = arith.constant 0 : index
    %186 = vector.load %arg9[%c2_125, %c0_126] : memref<32x256xf32, #tpu.memory_space<vmem>>, vector<18x256xf32>
    %c3_127 = arith.constant 3 : index
    %c0_128 = arith.constant 0 : index
    %187 = vector.load %arg9[%c3_127, %c0_128] : memref<32x256xf32, #tpu.memory_space<vmem>>, vector<18x256xf32>
    %188 = arith.maximumf %186, %187 : vector<18x256xf32>
    %c4_129 = arith.constant 4 : index
    %c0_130 = arith.constant 0 : index
    %189 = vector.load %arg9[%c4_129, %c0_130] : memref<32x256xf32, #tpu.memory_space<vmem>>, vector<18x256xf32>
    %190 = arith.maximumf %188, %189 : vector<18x256xf32>
    %191 = vector.extract_strided_slice %190 {offsets = [0, 0], sizes = [18, 128], strides = [1, 1]} : vector<18x256xf32> to vector<18x128xf32>
    %192 = vector.extract_strided_slice %190 {offsets = [0, 1], sizes = [18, 128], strides = [1, 1]} : vector<18x256xf32> to vector<18x128xf32>
    %193 = arith.maximumf %191, %192 : vector<18x128xf32>
    %194 = vector.extract_strided_slice %190 {offsets = [0, 2], sizes = [18, 128], strides = [1, 1]} : vector<18x256xf32> to vector<18x128xf32>
    %195 = arith.maximumf %193, %194 : vector<18x128xf32>
    %196 = vector.extract_strided_slice %195 {offsets = [1, 0], sizes = [16, 128], strides = [1, 1]} : vector<18x128xf32> to vector<16x128xf32>
    %c0_131 = arith.constant 0 : index
    %c0_132 = arith.constant 0 : index
    %c0_133 = arith.constant 0 : index
    %197 = vector.load %arg7[%c0_131, %c0_132, %c0_133] : memref<1x16x128xf32, #tpu.memory_space<vmem>>, vector<1x16x128xf32>
    %198 = vector.shape_cast %197 : vector<1x16x128xf32> to vector<16x128xf32>
    %199 = vector.shape_cast %196 : vector<16x128xf32> to vector<1x16x128xf32>
    tpu.vector_store %arg7[%c0_131, %c0_132, %c0_133], %199 {strides = array<i32>} : memref<1x16x128xf32, #tpu.memory_space<vmem>>, vector<1x16x128xf32>,
    %c3_134 = arith.constant 3 : index
    %c1_135 = arith.constant 1 : index
    %200 = vector.load %arg9[%c3_134, %c1_135] : memref<32x256xf32, #tpu.memory_space<vmem>>, vector<18x128xf32>
    tpu.vector_store %arg9[%c3_134, %c1_135], %195 {strides = array<i32>} : memref<32x256xf32, #tpu.memory_space<vmem>>, vector<18x128xf32>,
    %c3_136 = arith.constant 3 : index
    %c0_137 = arith.constant 0 : index
    %201 = vector.load %arg9[%c3_136, %c0_137] : memref<32x256xf32, #tpu.memory_space<vmem>>, vector<16x256xf32>
    %c4_138 = arith.constant 4 : index
    %c0_139 = arith.constant 0 : index
    %202 = vector.load %arg9[%c4_138, %c0_139] : memref<32x256xf32, #tpu.memory_space<vmem>>, vector<16x256xf32>
    %203 = arith.maximumf %201, %202 : vector<16x256xf32>
    %c5 = arith.constant 5 : index
    %c0_140 = arith.constant 0 : index
    %204 = vector.load %arg9[%c5, %c0_140] : memref<32x256xf32, #tpu.memory_space<vmem>>, vector<16x256xf32>
    %205 = arith.maximumf %203, %204 : vector<16x256xf32>
    %206 = vector.extract_strided_slice %205 {offsets = [0, 0], sizes = [16, 128], strides = [1, 1]} : vector<16x256xf32> to vector<16x128xf32>
    %207 = vector.extract_strided_slice %205 {offsets = [0, 1], sizes = [16, 128], strides = [1, 1]} : vector<16x256xf32> to vector<16x128xf32>
    %208 = arith.maximumf %206, %207 : vector<16x128xf32>
    %209 = vector.extract_strided_slice %205 {offsets = [0, 2], sizes = [16, 128], strides = [1, 1]} : vector<16x256xf32> to vector<16x128xf32>
    %210 = arith.maximumf %208, %209 : vector<16x128xf32>
    %c0_141 = arith.constant 0 : index
    %c0_142 = arith.constant 0 : index
    %c0_143 = arith.constant 0 : index
    %211 = vector.load %arg8[%c0_141, %c0_142, %c0_143] : memref<1x16x128xf32, #tpu.memory_space<vmem>>, vector<1x16x128xf32>
    %212 = vector.shape_cast %211 : vector<1x16x128xf32> to vector<16x128xf32>
    %213 = vector.shape_cast %210 : vector<16x128xf32> to vector<1x16x128xf32>
    tpu.vector_store %arg8[%c0_141, %c0_142, %c0_143], %213 {strides = array<i32>} : memref<1x16x128xf32, #tpu.memory_space<vmem>>, vector<1x16x128xf32>,
    return
  }
  func.func @transform_0(%arg0: i32, %arg1: i32) -> (i32, i32, i32, i32) {
    %c0_i32 = arith.constant 0 : i32
    %c0_i32_0 = arith.constant 0 : i32
    %c0_i32_1 = arith.constant 0 : i32
    return %arg0, %c0_i32, %arg1, %c0_i32_0 : i32, i32, i32, i32
  }
  func.func @transform_1(%arg0: i32, %arg1: i32) -> (i32, i32, i32, i32) {
    %c1_i32 = arith.constant 1 : i32
    %0 = arith.muli %arg1, %c1_i32 : i32
    %c1_i32_0 = arith.constant 1 : i32
    %1 = arith.addi %0, %c1_i32_0 : i32
    %c0_i32 = arith.constant 0 : i32
    %c0_i32_1 = arith.constant 0 : i32
    %c0_i32_2 = arith.constant 0 : i32
    return %arg0, %c0_i32, %1, %c0_i32_1 : i32, i32, i32, i32
  }
  func.func @transform_2(%arg0: i32, %arg1: i32) -> (i32, i32, i32) {
    %c0_i32 = arith.constant 0 : i32
    %c0_i32_0 = arith.constant 0 : i32
    return %arg0, %arg1, %c0_i32 : i32, i32, i32
  }
  func.func @transform_3(%arg0: i32, %arg1: i32) -> (i32, i32, i32) {
    %c0_i32 = arith.constant 0 : i32
    %c0_i32_0 = arith.constant 0 : i32
    return %arg0, %arg1, %c0_i32 : i32, i32, i32
  }
  func.func @transform_4(%arg0: i32, %arg1: i32) -> (i32, i32, i32) {
    %c0_i32 = arith.constant 0 : i32
    %c0_i32_0 = arith.constant 0 : i32
    return %arg0, %arg1, %c0_i32 : i32, i32, i32
  }
  func.func @transform_5(%arg0: i32, %arg1: i32) -> (i32, i32, i32) {
    %c0_i32 = arith.constant 0 : i32
    %c0_i32_0 = arith.constant 0 : i32
    return %arg0, %arg1, %c0_i32 : i32, i32, i32
  }
  func.func @transform_6(%arg0: i32, %arg1: i32) -> (i32, i32, i32) {
    %c0_i32 = arith.constant 0 : i32
    %c0_i32_0 = arith.constant 0 : i32
    return %arg0, %arg1, %c0_i32 : i32, i32, i32
  }
}

</mosaic_0001>

<bundles_post_ra>
// kernel: canny_edge_forward.1
= control target key start
LH: loop header
LB: loop body
LE: loop exit
PB: predicated region body
PF: predicated region fallthrough
CT: control target
= control target key end

     0   :  { %s3091_s21 = smov 0   ;;  %s3093_s22 = smov 0   ;;  %s4124_s0 = inlined_call_operand.vmem [shape: f32[2,3,32,128], index: 0, kind: input, shape index: {}, may-alias: {0,1}]   ;;  %s4125_s1 = inlined_call_operand.vmem [shape: f32[2,3,32,128], index: 1, kind: input, shape index: {}, may-alias: {0,1}]   ;;  %s4126_s2 = inlined_call_operand.vmem [shape: f32[2,16,128], index: 2, kind: output, shape index: {0}]   ;;  %s4127_s3 = inlined_call_operand.vmem [shape: f32[2,16,128], index: 3, kind: output, shape index: {1}]   ;;  %s4128_s4 = inlined_call_operand.vmem [shape: f32[2,16,128], index: 4, kind: output, shape index: {2}]   ;;  %s4129_s5 = inlined_call_operand.vmem [shape: f32[2,16,128], index: 5, kind: output, shape index: {3}]   ;;  %s4130_s6 = inlined_call_operand.vmem [shape: f32[2,16,128], index: 6, kind: output, shape index: {4}]  }
   0x1   :  { %s3095_s23 = smov 0   ;;  %s3097_s24 = smov 0  }
   0x2   :  { %s3099_s25 = smov 0  }
   0x3 LB: > { %s29_s26 = sadd.s32 1, %s3044_s24  ;;  %p45_p1 = scmp.ne.s32.totalorder %s3036_s22, %s3032_s21  ;;  %s3048_s25 = sphi %s3099_s25, %s17_s25   ;;  %s3044_s24 = sphi %s3097_s24, %s4137_s24   ;;  %s3040_s23 = sphi %s3095_s23, %s4136_s23   ;;  %s3036_s22 = sphi %s3093_s22, %s4135_s22   ;;  %s3032_s21 = sphi %s3091_s21, %s4134_s21  }
   0x4   : > { %p31_p0 = scmp.ge.s32.totalorder %s29_s26, 2  ;;  %p46_p2 = scmp.eq.s32.totalorder %s3048_s25, 0 }
   0x5   : > { %s38_s29 = sadd.s32 1, %s3036_s22  ;;  %p2913_p5 = scmp.ge.s32.totalorder %s3048_s25, 2 }
   0x6   : > { %s4139_s26 = smov (%p31_p0, %s29_s26), 0  ;;  %p3122_p3 = por %p46_p2, %p45_p1 }
   0x7   : > { %s33_s28 = ssub.s32 %s3044_s24, %s4139_s26  ;;  %241 = sbr.rel (%p2913_p5) target bundleno = 28 (0x1c), region = 16 }
   0x8   : > { %p36_p4 = scmp.eq.s32.totalorder %s33_s28, 0 }
   0xa   : > { %s3130_s30 = scalar_select %p36_p4, %s3036_s22, %s38_s29  }
   0xc   : > { %244 = sbr.rel (!%p3122_p3) target bundleno = 20 (0x14), region = 20  ;;  %s246_s7 = sand.u32 (%p3122_p3), 1, %s3036_s22  }
   0xd   : > { %s2949_s8 = smul.u32 (%p3122_p3), 96, %s3044_s24 }
   0xe   : > { %s2948_s9 = smul.u32 (%p3122_p3), 48, %s246_s7 }
   0xf   : > { %s253_s12 = scalar_lea.vmem (%p3122_p3), %s4124_s0, %s2949_s8 }
  0x10   : > { %v292_v0 = vld [vmem:[%s253_s12] sm:$0xff] (%p3122_p3)  ;;  %v294_v1 = vld [vmem:[%s253_s12 + $0x8] sm:$0xff] (%p3122_p3)  ;;  %s248_s13 = scalar_lea.vmem (%p3122_p3), [#allocation3], %s2948_s9 }
  0x11   : > { %v296_v2 = vld [vmem:[%s253_s12 + $0x20] sm:$0xff]  ;;  %293 = vst [vmem:[%s248_s13] sm:$0xff] %v292_v0  ;;  %295 = vst [vmem:[%s248_s13 + $0x8] sm:$0xff] %v294_v1  ;;  %v298_v3 = vld [vmem:[%s253_s12 + $0x28] sm:$0xff] }
  0x12   : > { %297 = vst [vmem:[%s248_s13 + $0x10] sm:$0xff] %v296_v2  ;;  %v300_v4 = vld [vmem:[%s253_s12 + $0x40] sm:$0xff]  ;;  %v302_v5 = vld [vmem:[%s253_s12 + $0x48] sm:$0xff]  ;;  %299 = vst [vmem:[%s248_s13 + $0x18] sm:$0xff] %v298_v3 }
  0x13   : > { %301 = vst [vmem:[%s248_s13 + $0x20] sm:$0xff] %v300_v4  ;;  %303 = vst [vmem:[%s248_s13 + $0x28] sm:$0xff] %v302_v5 }
  0x14 PF: > { %309 = sbr.rel (!%p3122_p3) target bundleno = 28 (0x1c), region = 58  ;;  %s311_s14 = sand.u32 (%p3122_p3), 1, %s3036_s22  }
  0x15   : > { %s2915_s15 = smul.u32 (%p3122_p3), 96, %s3044_s24 }
  0x16   : > { %s2950_s16 = smul.u32 (%p3122_p3), 48, %s311_s14 }
  0x17   : > { %s2741_s19 = scalar_lea.vmem (%p3122_p3), %s4125_s1, %s2915_s15 }
  0x18   : > { %v2916_v6 = vld [vmem:[%s2741_s19 + $0x10] sm:$0xff] (%p3122_p3)  ;;  %v2917_v7 = vld [vmem:[%s2741_s19 + $0x18] sm:$0xff] (%p3122_p3)  ;;  %s313_s20 = scalar_lea.vmem (%p3122_p3), [#allocation4], %s2950_s16 }
  0x19   : > { %v2918_v8 = vld [vmem:[%s2741_s19 + $0x30] sm:$0xff]  ;;  %359 = vst [vmem:[%s313_s20] sm:$0xff] %v2916_v6  ;;  %361 = vst [vmem:[%s313_s20 + $0x8] sm:$0xff] %v2917_v7  ;;  %v2919_v9 = vld [vmem:[%s2741_s19 + $0x38] sm:$0xff] }
  0x1a   : > { %363 = vst [vmem:[%s313_s20 + $0x10] sm:$0xff] %v2918_v8  ;;  %v2920_v10 = vld [vmem:[%s2741_s19 + $0x50] sm:$0xff]  ;;  %v2921_v11 = vld [vmem:[%s2741_s19 + $0x58] sm:$0xff]  ;;  %365 = vst [vmem:[%s313_s20 + $0x18] sm:$0xff] %v2919_v9 }
  0x1b   : > { %367 = vst [vmem:[%s313_s20 + $0x20] sm:$0xff] %v2920_v10  ;;  %369 = vst [vmem:[%s313_s20 + $0x28] sm:$0xff] %v2921_v11 }
  0x1c PF: > { %p2922_p6 = scmp.ge.s32.totalorder %s3048_s25, 1  ;;  %p374_p7 = scmp.lt.s32.totalorder %s3048_s25, 3 }
  0x1e   : > { %p375_p8 = pnand %p2922_p6, %p374_p7 }
  0x1f   : > { %s381_s27 = sand.u32 (!%p375_p8), 1, %s3032_s21   ;;  %s3051_s7 = smov (!%p375_p8), 126  }
  0x20   : > { %378 = sbr.rel (%p375_p8) target bundleno = 2710 (0xa96), region = 96  ;;  %s3052_s8 = smov (!%p375_p8), 124  }
  0x21   : > { %s3157_s28 = smul.u32 (!%p375_p8), 48, %s381_s27  ;;  %s3053_s9 = smov (!%p375_p8), 127  }
  0x22   : > { %s3054_s10 = smov (!%p375_p8), 1   ;;  %s3055_s11 = smov (!%p375_p8), 2  }
  0x23   : > { %s390_s29 = scalar_lea.vmem (!%p375_p8), [#allocation4], %s3157_s28  ;;  %s383_s21 = scalar_lea.vmem (!%p375_p8), [#allocation3], %s3157_s28 }
  0x24   : > { %p465_p9 = scmp.lt.s32.totalorder (!%p375_p8), %s3040_s23, 1 }
  0x25   : > { %vm630_vm0 = vcmask 1045504   ;;  %v3050_v12 = vmov 0.0   ;;  %v2937_v15 = vld [vmem:[%s390_s29 + $0x20] sm:$0xff]  ;;  %v2938_v16 = vld [vmem:[%s390_s29 + $0x28] sm:$0xff]  ;;  %v2939_v17 = vld [vmem:[%s390_s29 + $0x10] sm:$0xff]  ;;  %vm579_vm1 = vcmask 1043456  }
  0x26   : > { %557 = vst [vmem:[#allocation2 + $0x28] sm:$0xff] %v3050_v12  ;;  %558 = vst [vmem:[#allocation2 + $0x38] sm:$0xff] %v3050_v12  ;;  %v3153_v13 = vrot.slane %v3050_v12, 2  ;;  %v3160_v14 = vrot.slane %v3050_v12, 4  ;;  %v538_v18 = vmul.f32 0.299, %v2937_v15 }
  0x27   : > { %555 = vst [vmem:[#allocation2 + $0x8] sm:$0xff] %v3050_v12  ;;  %556 = vst [vmem:[#allocation2 + $0x18] sm:$0xff] %v3050_v12  ;;  %v2940_v19 = vld [vmem:[%s390_s29 + $0x18] sm:$0xff]  ;;  %v547_v20 = vld [vmem:[%s390_s29] sm:$0xff]  ;;  %v539_v21 = vmul.f32 0.299, %v2938_v16 }
  0x28   : > { %v543_v22 = vmul.f32 0.587, %v2939_v17  ;;  %v544_v23 = vmul.f32 0.587, %v2940_v19  ;;  %v549_v24 = vmul.f32 0.114, %v547_v20 }
  0x29   : > { %v548_v32 = vld [vmem:[%s390_s29 + $0x8] sm:$0xff]  ;;  %v3166_v35 = vmul.f32 0.24420135, %v3153_v13  ;;  %vm677_vm2 = vcmask 1046528   ;;  %v2933_v52 = vld [vmem:[%s383_s21 + $0x20] sm:$0xff]  ;;  %v2935_v58 = vld [vmem:[%s383_s21 + $0x10] sm:$0xff] }
  0x2a   : > { %v545_v28 = vadd.f32 %v543_v22, %v538_v18  ;;  %v546_v36 = vadd.f32 %v544_v23, %v539_v21  ;;  %v550_v45 = vmul.f32 0.114, %v548_v32  ;;  %v2934_v53 = vld [vmem:[%s383_s21 + $0x28] sm:$0xff]  ;;  %v3186_v54 = vmul.f32 0.054488685, %v3160_v14  ;;  %v2936_v61 = vld [vmem:[%s383_s21 + $0x18] sm:$0xff] }
  0x2b   : > { %v682_v56 = vrot.slane %v3166_v35, 1  ;;  %v527_v62 = vld [vmem:[%s383_s21] sm:$0xff]  ;;  %v528_v63 = vld [vmem:[%s383_s21 + $0x8] sm:$0xff]  ;;  %v518_v2 = vmul.f32 0.299, %v2933_v52  ;;  %vm815_vm3 = vcmask 1031168  }
  0x2c   : > { %v3168_v37 = vadd.f32 %v549_v24, %v545_v28  ;;  %v3182_v51 = vadd.f32 %v550_v45, %v546_v36  ;;  %v519_v3 = vmul.f32 0.299, %v2934_v53  ;;  %v523_v7 = vmul.f32 0.587, %v2935_v58  ;;  %s4141_s23 = smov (!%p465_p9, %s3040_s23), 1 }
  0x2d   : > { %v621_v25 = vld [vmem:[#allocation2 + $0x38] sm:$0x1f]  ;;  %v524_v11 = vmul.f32 0.587, %v2936_v61  ;;  %v529_v17 = vmul.f32 0.114, %v527_v62 }
  0x2e   : > { %v625_v26 = vld [vmem:[#allocation2 + $0x38] sm:$0x7f]  ;;  %v568_v31 = vld [vmem:[#allocation2 + $0x8] sm:$0xf0]  ;;  %553 = vst [vmem:[#allocation2 + $0x20] sm:$0xff] %v3168_v37  ;;  %554 = vst [vmem:[#allocation2 + $0x30] sm:$0xff] %v3182_v51  ;;  %v525_v16 = vadd.f32 %v523_v7, %v518_v2 }
  0x2f   : > { %v711_v27 = vld [vmem:[#allocation2 + $0x38] sm:$0x3f]  ;;  %v643_v29 = vrot.slane %v625_v26, 2  ;;  %v583_v33 = vrot.slane %v568_v31, 4  ;;  %v623_v34 = vld [vmem:[#allocation2 + $0x8] sm:$0xf8]  ;;  %v526_v21 = vadd.f32 %v524_v11, %v519_v3 }
  0x30   : > { %v3163_v30 = vmul.f32 0.40261996, %v711_v27  ;;  %v619_v40 = vld [vmem:[#allocation2 + $0x8] sm:$0xfe]  ;;  %v634_v41 = vrot.slane %v623_v34, 2  ;;  %v586_v6 = vrot.slane %v3168_v37, 4  ;;  %v531_v23 = vadd.f32 %v529_v17, %v525_v16 }
  0x31   : > { %v644_v38 = vsel %vm630_vm0, %v3153_v13, %v643_v29  ;;  %v660_v39 = vadd.f32 %v643_v29, %v621_v25  ;;  %v709_v42 = vld [vmem:[#allocation2 + $0x8] sm:$0xfc]  ;;  %v585_v43 = vsel %vm579_vm1, %v583_v33, %v3160_v14  ;;  %v590_v10 = vrot.slane %v3182_v51, 4  ;;  %v566_v32 = vld [vmem:[#allocation2 + $0x38] sm:$0xf]  ;;  %s3962_s12 = sshll.u32 %s4141_s23, 4 }
  0x32   : > { %v713_v44 = vmul.f32 0.40261996, %v709_v42  ;;  %v740_v47 = vrot.slane %v3163_v30, 2  ;;  %v636_v48 = vsel %vm630_vm0, %v634_v41, %v3153_v13  ;;  %v3180_v49 = vmul.f32 0.24420135, %v644_v38  ;;  %533 = vst [vmem:[#allocation2] sm:$0xff] %v531_v23  ;;  %s482_s15 = scalar_lea.vmem %s4127_s3, %s3962_s12  ;;  %s492_s17 = scalar_lea.vmem %s4128_s4, %s3962_s12 }
  0x33   : > { %v3175_v46 = vmul.f32 0.24420135, %v660_v39  ;;  %v654_v50 = vadd.f32 %v636_v48, %v619_v40  ;;  %v611_v1 = vmul.f32 0.054488685, %v585_v43  ;;  %v530_v18 = vmul.f32 0.114, %v528_v63  ;;  %s502_s20 = scalar_lea.vmem %s4129_s5, %s3962_s12  ;;  %s4067_s29 = scalar_lea.vmem %s4126_s2, %s3962_s12 }
  0x34   : > { %v731_v57 = vrot.slane %v713_v44, 2  ;;  %v686_v59 = vrot.slane %v3180_v49, 1  ;;  %v741_v0 = vsel %vm630_vm0, %v3153_v13, %v740_v47  ;;  %v637_v22 = vrot.slane %v3168_v37, 2 }
  0x35   : > { %v690_v55 = vrot.slane %v3175_v46, 1  ;;  %v662_v60 = vmul.f32 0.24420135, %v654_v50  ;;  %v591_v25 = vsel %vm579_vm1, %v586_v6, %v590_v10  ;;  %v620_v26 = vld [vmem:[#allocation2 + $0x30] sm:$0x1f]  ;;  %v532_v29 = vadd.f32 %v530_v18, %v526_v21 }
  0x36   : > { %v733_v9 = vsel %vm630_vm0, %v731_v57, %v3153_v13  ;;  %v624_v27 = vld [vmem:[#allocation2 + $0x30] sm:$0x7f]  ;;  %v3218_v33 = vmul.f32 0.40261996, %v3168_v37  ;;  %v606_v36 = vadd.f32 %v591_v25, %v3168_v37  ;;  %v609_v42 = vadd.f32 %v3160_v14, %v566_v32 }
  0x37   : > { %v691_v4 = vsel %vm677_vm2, %v686_v59, %v690_v55  ;;  %v681_v5 = vrot.slane %v662_v60, 1  ;;  %v710_v28 = vld [vmem:[#allocation2 + $0x30] sm:$0x3f]  ;;  %v641_v31 = vrot.slane %v624_v27, 2  ;;  %534 = vst [vmem:[#allocation2 + $0x10] sm:$0xff] %v532_v29  ;;  %v632_v35 = vrot.slane %v532_v29, 2 }
  0x38   : > { %v705_v8 = vadd.f32 %v691_v4, %v3186_v54  ;;  %v3220_v34 = vmul.f32 0.40261996, %v710_v28  ;;  %v734_v45 = vrot.slane %v3218_v33, 2  ;;  %v687_v49 = vsel %vm677_vm2, %v682_v56, %v686_v59 }
  0x39   : > { %v683_v15 = vsel %vm677_vm2, %v681_v5, %v682_v56  ;;  %v642_v38 = vsel %vm630_vm0, %v637_v22, %v641_v31  ;;  %v659_v39 = vadd.f32 %v641_v31, %v620_v26  ;;  %v638_v41 = vsel %vm630_vm0, %v632_v35, %v637_v22  ;;  %v567_v60 = vld [vmem:[#allocation2] sm:$0xf0] }
  0x3a   : > { %v3205_v19 = vadd.f32 %v741_v0, %v705_v8  ;;  %v701_v20 = vadd.f32 %v683_v15, %v611_v1  ;;  %v657_v40 = vadd.f32 %v642_v38, %v3168_v37  ;;  %v738_v48 = vrot.slane %v3220_v34, 2  ;;  %v622_v62 = vld [vmem:[#allocation2] sm:$0xf8] }
  0x3b   : > { %v667_v43 = vmul.f32 0.24420135, %v659_v39  ;;  %v614_v50 = vmul.f32 0.054488685, %v606_v36  ;;  %v581_v53 = vrot.slane %v532_v29, 4  ;;  %v655_v57 = vadd.f32 %v638_v41, %v532_v29 }
  0x3c   : > { %809 = vrot.lane.b32.xlu1 %v3205_v19, %s3051_s7  ;;  %v3210_v24 = vadd.f32 %v733_v9, %v701_v20  ;;  %v665_v44 = vmul.f32 0.24420135, %v657_v40  ;;  %v617_v61 = vmul.f32 0.054488685, %v609_v42  ;;  %v580_v37 = vrot.slane %v567_v60, 4 }
  0x3d   : > { %v688_v52 = vrot.slane %v667_v43, 1  ;;  %v708_v63 = vld [vmem:[#allocation2] sm:$0xfc]  ;;  %v703_v14 = vadd.f32 %v687_v49, %v3186_v54  ;;  %v587_v0 = vsel %vm579_vm1, %v581_v53, %v586_v6  ;;  %v739_v2 = vsel %vm630_vm0, %v734_v45, %v738_v48  ;;  %v565_v6 = vld [vmem:[#allocation2 + $0x30] sm:$0xf] }
  0x3e   : > { %801 = vrot.lane.b32.xlu0 %v3210_v24, %s3051_s7  ;;  %v684_v58 = vrot.slane %v665_v44, 1  ;;  %v618_v3 = vld [vmem:[#allocation2] sm:$0xfe]  ;;  %v631_v56 = vrot.slane %v622_v62, 2  ;;  %v714_v59 = vmul.f32 0.40261996, %v532_v29  ;;  %v582_v5 = vsel %vm579_vm1, %v580_v37, %v581_v53 }
  0x3f   : > { %v663_v7 = vmul.f32 0.24420135, %v655_v57  ;;  %v712_v8 = vmul.f32 0.40261996, %v708_v63  ;;  %v602_v9 = vadd.f32 %v582_v5, %v531_v23  ;;  %v604_v15 = vadd.f32 %v587_v0, %v532_v29 }
  0x40   : > { %v689_v1 = vsel %vm677_vm2, %v684_v58, %v688_v52  ;;  %v633_v11 = vsel %vm630_vm0, %v631_v56, %v632_v35  ;;  %v3239_v17 = vadd.f32 %v703_v14, %v3153_v13  ;;  %v707_v18 = vadd.f32 %v690_v55, %v617_v61 }
  0x41   : > { %v704_v4 = vadd.f32 %v689_v1, %v614_v50  ;;  %v653_v54 = vadd.f32 %v633_v11, %v618_v3  ;;  %v679_v21 = vrot.slane %v663_v7, 1  ;;  %v728_v22 = vrot.slane %v712_v8, 2 }
  0x42   : > { %v729_v23 = vrot.slane %v714_v59, 2  ;;  %v610_v25 = vmul.f32 0.054488685, %v602_v9  ;;  %v612_v26 = vmul.f32 0.054488685, %v604_v15  ;;  %v608_v27 = vadd.f32 %v590_v10, %v565_v6 }
  0x43   : > { %v3236_v16 = vadd.f32 %v739_v2, %v704_v4  ;;  %v661_v20 = vmul.f32 0.24420135, %v653_v54  ;;  %v685_v29 = vsel %vm677_vm2, %v679_v21, %v684_v58  ;;  %v3254_v55 = vadd.f32 %v740_v47, %v707_v18 }
  0x44   : > { %v730_v46 = vsel %vm630_vm0, %v728_v22, %v729_v23  ;;  %v702_v32 = vadd.f32 %v685_v29, %v612_v26  ;;  %v616_v33 = vmul.f32 0.054488685, %v608_v27  ;;  %v735_v51 = vsel %vm630_vm0, %v729_v23, %v734_v45 }
  0x45   : > { %807 = vrot.lane.b32.xlu1 %v3236_v16, %s3051_s7  ;;  %v678_v28 = vrot.slane %v661_v20, 1  ;;  %v882_v47 = vmul.f32 0.40261996, %v3210_v24  ;;  %v886_v36 = vmul.f32 0.40261996, %v3205_v19  ;;  %vm782_vm4 = vcmask 1014784  }
  0x46   : > { %v3263_v34 = vadd.f32 %v735_v51, %v702_v32  ;;  %v706_v35 = vadd.f32 %v688_v52, %v616_v33  ;;  %v885_v39 = vmul.f32 0.40261996, %v3236_v16  ;;  %v884_v3 = vmul.f32 0.40261996, %v3239_v17 }
  0x47   : > { %v680_v13 = vsel %vm677_vm2, %v678_v28, %v679_v21  ;;  %v888_v59 = vmul.f32 0.40261996, %v3254_v55  ;;  %vm868_vm5 = vcmask 1039360   ;;  %vm941_vm6 = vcmask 1047560  }
  0x48   : > { %v700_v31 = vadd.f32 %v680_v13, %v610_v25  ;;  %v3268_v30 = vadd.f32 %v738_v48, %v706_v35  ;;  %v883_v5 = vmul.f32 0.40261996, %v3263_v34  ;;  %vm943_vm7 = vcmask 7168  }
  0x49   : > { %805 = vrot.lane.b32.xlu1 %v3239_v17, %s3051_s7  ;;  %vm949_vm8 = vcmask 1043464   ;;  %vm951_vm9 = vcmask 3072   ;;  %vm997_vm10 = vcmask 146568   ;;  %vm1001_vm12 = vcmask 142472  }
  0x4a   : > { %v3257_v10 = vadd.f32 %v730_v46, %v700_v31  ;;  %v887_v9 = vmul.f32 0.40261996, %v3268_v30  ;;  %vm1125_vm13 = vcmask 1041408   ;;  %vm1444_vm14 = vcmask 1024  }
  0x4b   : > { %vm1449_vm15 = vcmask 140424   ;;  %vm1455_vm1 = vcmask 9224  }
  0x4c   : > { %799 = vrot.lane.b32.xlu0 %v3257_v10, %s3051_s7  ;;  %v881_v38 = vmul.f32 0.40261996, %v3257_v10 }
  0x4d   : > { %813 = vrot.lane.b32.xlu1 %v3254_v55, %s3051_s7 }
  0x50   : > { %803 = vrot.lane.b32.xlu0 %v3263_v34, %s3051_s7 }
  0x51   : > { %768 = vrot.lane.b32.xlu1 %v3210_v24, %s3052_s8 }
  0x54   : > { %811 = vrot.lane.b32.xlu0 %v3268_v30, %s3051_s7 }
  0x55   : > { %776 = vrot.lane.b32.xlu1 %v3205_v19, %s3052_s8 }
  0x58   : > { %766 = vrot.lane.b32.xlu0 %v3257_v10, %s3052_s8 }
  0x59   : > { %899 = vrot.lane.b32.xlu1 %v882_v47, %s3051_s7 }
  0x5c   : > { %774 = vrot.lane.b32.xlu0 %v3236_v16, %s3052_s8 }
  0x5d   : > { %907 = vrot.lane.b32.xlu1 %v886_v36, %s3051_s7 }
  0x60   : > { %770 = vrot.lane.b32.xlu0 %v3263_v34, %s3052_s8 }
  0x61   : > { %772 = vrot.lane.b32.xlu1 %v3239_v17, %s3052_s8 }
  0x64   : > { %897 = vrot.lane.b32.xlu0 %v881_v38, %s3051_s7 }
  0x65   : > { %780 = vrot.lane.b32.xlu1 %v3254_v55, %s3052_s8 }
  0x68   : > { %905 = vrot.lane.b32.xlu0 %v885_v39, %s3051_s7 }
  0x6c   : > { %778 = vrot.lane.b32.xlu0 %v3268_v30, %s3052_s8 }
  0xae   : > { %v810_v40 = vpop.permute.xlu1 %809 }
  0xaf   : > { %v833_v53 = vadd.f32 %v810_v40, %v3205_v19 }
  0xb0   : > { %v802_v42 = vpop.permute.xlu0 %801 }
  0xb1   : > { %v829_v49 = vadd.f32 %v802_v42, %v3210_v24  ;;  %v841_v62 = vmul.f32 0.24420135, %v833_v53 }
  0xb3   : > { %v837_v57 = vmul.f32 0.24420135, %v829_v49 }
  0xb7   : > { %v808_v41 = vpop.permute.xlu1 %807 }
  0xb8   : > { %v818_v19 = vsel %vm815_vm3, %v808_v41, %v810_v40 }
  0xb9   : > { %v832_v1 = vadd.f32 %v818_v19, %v3236_v16 }
  0xbb   : > { %v806_v43 = vpop.permute.xlu1 %805  ;;  %v840_v56 = vmul.f32 0.24420135, %v832_v1 }
  0xbc   : > { %v831_v37 = vadd.f32 %v806_v43, %v3239_v17 }
  0xbe   : > { %v800_v45 = vpop.permute.xlu0 %799  ;;  %v839_v0 = vmul.f32 0.24420135, %v831_v37 }
  0xbf   : > { %v814_v44 = vpop.permute.xlu1 %813  ;;  %v816_v60 = vsel %vm815_vm3, %v800_v45, %v802_v42 }
  0xc0   : > { %v835_v48 = vadd.f32 %v814_v44, %v3254_v55  ;;  %v828_v63 = vadd.f32 %v816_v60, %v3257_v10 }
  0xc2   : > { %v843_v50 = vmul.f32 0.24420135, %v835_v48  ;;  %v804_v52 = vpop.permute.xlu0 %803  ;;  %v836_v2 = vmul.f32 0.24420135, %v828_v63 }
  0xc3   : > { %v817_v4 = vsel %vm815_vm3, %v804_v52, %v806_v43  ;;  %v769_v11 = vpop.permute.xlu1 %768 }
  0xc4   : > { %866 = vrot.lane.b32.xlu1 %v843_v50, %s3053_s9  ;;  %v830_v7 = vadd.f32 %v817_v4, %v3263_v34 }
  0xc6   : > { %v812_v58 = vpop.permute.xlu0 %811  ;;  %v838_v8 = vmul.f32 0.24420135, %v830_v7 }
  0xc7   : > { %v819_v61 = vsel %vm815_vm3, %v812_v58, %v814_v44  ;;  %v777_v15 = vpop.permute.xlu1 %776 }
  0xc8   : > { %854 = vrot.lane.b32.xlu1 %v837_v57, %s3053_s9  ;;  %v834_v24 = vadd.f32 %v819_v61, %v3268_v30 }
  0xca   : > { %v842_v14 = vmul.f32 0.24420135, %v834_v24  ;;  %v767_v54 = vpop.permute.xlu0 %766 }
  0xcb   : > { %v900_v6 = vpop.permute.xlu1 %899  ;;  %v783_v29 = vsel %vm782_vm4, %v767_v54, %v769_v11 }
  0xcc   : > { %862 = vrot.lane.b32.xlu1 %v841_v62, %s3053_s9  ;;  %864 = vrot.lane.b32.xlu0 %v842_v14, %s3053_s9  ;;  %v791_v13 = vadd.f32 %v783_v29, %v3257_v10 }
  0xce   : > { %v775_v17 = vpop.permute.xlu0 %774  ;;  %v795_v32 = vmul.f32 0.054488685, %v791_v13 }
  0xcf   : > { %v908_v18 = vpop.permute.xlu1 %907  ;;  %v785_v31 = vsel %vm782_vm4, %v775_v17, %v777_v15 }
  0xd0   : > { %858 = vrot.lane.b32.xlu1 %v839_v0, %s3053_s9  ;;  %852 = vrot.lane.b32.xlu0 %v836_v2, %s3053_s9  ;;  %v793_v33 = vadd.f32 %v785_v31, %v3236_v16 }
  0xd2   : > { %v771_v20 = vpop.permute.xlu0 %770  ;;  %v797_v39 = vmul.f32 0.054488685, %v793_v33 }
  0xd3   : > { %v773_v21 = vpop.permute.xlu1 %772 }
  0xd4   : > { %903 = vrot.lane.b32.xlu1 %v884_v3, %s3051_s7  ;;  %860 = vrot.lane.b32.xlu0 %v840_v56, %s3053_s9  ;;  %v784_v10 = vsel %vm782_vm4, %v771_v20, %v773_v21  ;;  %v1009_v20 = vlaneseq }
  0xd5   : > { %v792_v45 = vadd.f32 %v784_v10, %v3263_v34 }
  0xd6   : > { %v898_v22 = vpop.permute.xlu0 %897  ;;  %vm1011_vm11 = vcmp.lt.s32.totalorder %v1009_v20, 256 }
  0xd7   : > { %v781_v23 = vpop.permute.xlu1 %780  ;;  %v913_v38 = vsel %vm815_vm3, %v898_v22, %v900_v6  ;;  %v796_v53 = vmul.f32 0.054488685, %v792_v45 }
  0xd8   : > { %911 = vrot.lane.b32.xlu1 %v888_v59, %s3051_s7  ;;  %901 = vrot.lane.b32.xlu0 %v883_v5, %s3051_s7 }
  0xda   : > { %v906_v25 = vpop.permute.xlu0 %905 }
  0xdb   : > { %v915_v16 = vsel %vm815_vm3, %v906_v25, %v908_v18 }
  0xdc   : > { %856 = vrot.lane.b32.xlu0 %v838_v8, %s3053_s9 }
  0xde   : > { %v779_v27 = vpop.permute.xlu0 %778 }
  0xdf   : > { %v786_v42 = vsel %vm782_vm4, %v779_v27, %v781_v23 }
  0xe0   : > { %909 = vrot.lane.b32.xlu0 %v887_v9, %s3051_s7  ;;  %v794_v48 = vadd.f32 %v786_v42, %v3268_v30 }
  0xe2   : > { %v798_v57 = vmul.f32 0.054488685, %v794_v48 }
 0x136   : > { %v867_v26 = vpop.permute.xlu1 %866 }
 0x13a   : > { %v855_v28 = vpop.permute.xlu1 %854 }
 0x13e   : > { %v865_v46 = vpop.permute.xlu0 %864  ;;  %v863_v55 = vpop.permute.xlu1 %862 }
 0x13f   : > { %v872_v60 = vsel %vm868_vm5, %v865_v46, %v867_v26 }
 0x140   : > { %v880_v63 = vadd.f32 %v872_v60, %v798_v57 }
 0x142   : > { %v853_v51 = vpop.permute.xlu0 %852  ;;  %v859_v36 = vpop.permute.xlu1 %858 }
 0x143   : > { %v869_v35 = vsel %vm868_vm5, %v853_v51, %v855_v28 }
 0x144   : > { %v877_v47 = vadd.f32 %v869_v35, %v795_v32 }
 0x146   : > { %v861_v40 = vpop.permute.xlu0 %860  ;;  %v921_v41 = vadd.f32 %v913_v38, %v877_v47  ;;  %v904_v52 = vpop.permute.xlu1 %903 }
 0x147   : > { %v871_v43 = vsel %vm868_vm5, %v861_v40, %v863_v55 }
 0x148   : > { %v879_v44 = vadd.f32 %v871_v43, %v797_v39  ;;  %929 = vrot.lane.b32.xlu0 %v921_v41, %s3054_s10 }
 0x14a   : > { %v902_v49 = vpop.permute.xlu0 %901  ;;  %v923_v50 = vadd.f32 %v915_v16, %v879_v44  ;;  %v912_v24 = vpop.permute.xlu1 %911 }
 0x14b   : > { %v914_v62 = vsel %vm815_vm3, %v902_v49, %v904_v52 }
 0x14c   : > { %933 = vrot.lane.b32.xlu1 %v923_v50, %s3054_s10 }
 0x14e   : > { %v857_v58 = vpop.permute.xlu0 %856 }
 0x14f   : > { %v870_v61 = vsel %vm868_vm5, %v857_v58, %v859_v36 }
 0x150   : > { %v878_v37 = vadd.f32 %v870_v61, %v796_v53 }
 0x152   : > { %v910_v34 = vpop.permute.xlu0 %909  ;;  %v922_v14 = vadd.f32 %v914_v62, %v878_v37 }
 0x153   : > { %v916_v30 = vsel %vm815_vm3, %v910_v34, %v912_v24 }
 0x154   : > { %v924_v19 = vadd.f32 %v916_v30, %v880_v63  ;;  %931 = vrot.lane.b32.xlu0 %v922_v14, %s3054_s10 }
 0x156   : > { %935 = vrot.lane.b32.xlu1 %v924_v19, %s3054_s10 }
 0x1ba   : > { %v930_v0 = vpop.permute.xlu0 %929 }
 0x1bb   : > { %942 = vst.msk [vmem:[#allocation2] sm:$0xff] %vm941_vm6, %v930_v0 }
 0x1bc   : > { %944 = vst.msk [vmem:[#allocation2 + $0x8] sm:$0xff] %vm943_vm7, %v930_v0 }
 0x1be   : > { %v934_v1 = vpop.permute.xlu1 %933 }
 0x1bf   : > { %947 = vst.msk [vmem:[#allocation2 + $0x20] sm:$0xff] %vm941_vm6, %v934_v1 }
 0x1c0   : > { %948 = vst.msk [vmem:[#allocation2 + $0x28] sm:$0xff] %vm943_vm7, %v934_v1 }
 0x1c2   : > { %v953_v2 = vld [vmem:[#allocation2] sm:$0xff] }
 0x1c3   : > { %961 = vrot.lane.b32.xlu0 %v953_v2, %s3053_s9 }
 0x1c6   : > { %v932_v3 = vpop.permute.xlu0 %931  ;;  %v955_v56 = vld [vmem:[#allocation2 + $0x20] sm:$0xff] }
 0x1c7   : > { %945 = vst.msk [vmem:[#allocation2 + $0x10] sm:$0xff] %vm941_vm6, %v932_v3  ;;  %965 = vrot.lane.b32.xlu1 %v955_v56, %s3053_s9 }
 0x1c8   : > { %946 = vst.msk [vmem:[#allocation2 + $0x18] sm:$0xff] %vm943_vm7, %v932_v3  ;;  %v936_v59 = vpop.permute.xlu1 %935 }
 0x1c9   : > { %950 = vst.msk [vmem:[#allocation2 + $0x30] sm:$0xf] %vm949_vm8, %v936_v59 }
 0x1ca   : > { %952 = vst.msk [vmem:[#allocation2 + $0x38] sm:$0xf] %vm951_vm9, %v936_v59 }
 0x1ce   : > { %v954_v4 = vld [vmem:[#allocation2 + $0x10] sm:$0xff] }
 0x1cf   : > { %963 = vrot.lane.b32.xlu0 %v954_v4, %s3053_s9  ;;  %v3358_v27 = vld [vmem:[#allocation2 + $0x18] sm:$0xff] }
 0x1d0   : > { %v956_v5 = vld [vmem:[#allocation2 + $0x30] sm:$0xf]  ;;  %v1130_v33 = vrot.slane %v3358_v27, 6 }
 0x1d1   : > { %967 = vrot.lane.b32.xlu1 %v956_v5, %s3053_s9  ;;  %v3422_v61 = vld [vmem:[#allocation2 + $0x38] sm:$0x3] }
 0x1d2   : > { %v1138_v34 = vrot.slane %v3422_v61, 6  ;;  %v3438_v56 = vld [vmem:[#allocation2 + $0x38] sm:$0xf] }
 0x235   : > { %v962_v7 = vpop.permute.xlu0 %961 }
 0x236   : > { %973 = vst.msk [vmem:[#allocation2] sm:$0xff] %vm943_vm7, %v962_v7 }
 0x239   : > { %v966_v8 = vpop.permute.xlu1 %965 }
 0x23a   : > { %975 = vst.msk [vmem:[#allocation2 + $0x20] sm:$0xff] %vm943_vm7, %v966_v8 }
 0x23d   : > { %v977_v9 = vld [vmem:[#allocation2] sm:$0xff] }
 0x23e   : > { %985 = vrot.lane.b32.xlu0 %v977_v9, %s3054_s10 }
 0x241   : > { %v964_v11 = vpop.permute.xlu0 %963  ;;  %v979_v15 = vld [vmem:[#allocation2 + $0x20] sm:$0xff] }
 0x242   : > { %974 = vst.msk [vmem:[#allocation2 + $0x10] sm:$0xff] %vm943_vm7, %v964_v11  ;;  %989 = vrot.lane.b32.xlu1 %v979_v15, %s3054_s10 }
 0x243   : > { %v968_v54 = vpop.permute.xlu1 %967 }
 0x244   : > { %976 = vst.msk [vmem:[#allocation2 + $0x30] sm:$0xf] %vm951_vm9, %v968_v54 }
 0x249   : > { %v978_v6 = vld [vmem:[#allocation2 + $0x10] sm:$0xff] }
 0x24a   : > { %987 = vrot.lane.b32.xlu0 %v978_v6, %s3054_s10  ;;  %v3447_v6 = vld [vmem:[#allocation2 + $0x38] sm:$0x7] }
 0x24b   : > { %v980_v17 = vld [vmem:[#allocation2 + $0x30] sm:$0xf]  ;;  %1456 = vst.msk [vmem:[#allocation2 + $0x38] sm:$0x3] %vm1455_vm1, %v3050_v12 }
 0x24c   : > { %991 = vrot.lane.b32.xlu1 %v980_v17, %s3054_s10 }
 0x2b0   : > { %v986_v18 = vpop.permute.xlu0 %985 }
 0x2b1   : > { %998 = vst.msk [vmem:[#allocation2] sm:$0xff] %vm997_vm10, %v986_v18 }
 0x2b4   : > { %v990_v21 = vpop.permute.xlu1 %989 }
 0x2b5   : > { %1000 = vst.msk [vmem:[#allocation2 + $0x20] sm:$0xff] %vm997_vm10, %v990_v21 }
 0x2b8   : > { %v1008_v22 = vld [vmem:[#allocation2 + $0x6] ss:$8 sm:$0x3] }
 0x2b9   : > { %1014 = vst.msk [vmem:[#allocation2 + $0x5] ss:$8 sm:$0x3] %vm1011_vm11, %v1008_v22 }
 0x2bc   : > { %v1017_v23 = vld [vmem:[#allocation2 + $0x25] ss:$8 sm:$0x3]  ;;  %v988_v25 = vpop.permute.xlu0 %987 }
 0x2bd   : > { %1019 = vst.msk [vmem:[#allocation2 + $0x26] ss:$8 sm:$0x3] %vm1011_vm11, %v1017_v23 }
 0x2be   : > { %999 = vst.msk [vmem:[#allocation2 + $0x10] sm:$0xff] %vm997_vm10, %v988_v25  ;;  %v992_v26 = vpop.permute.xlu1 %991 }
 0x2bf   : > { %1002 = vst.msk [vmem:[#allocation2 + $0x30] sm:$0xf] %vm1001_vm12, %v992_v26 }
 0x2c0   : > { %v3360_v28 = vld [vmem:[#allocation2 + $0x8] sm:$0xff]  ;;  %v3362_v29 = vld [vmem:[#allocation2] sm:$0xff] }
 0x2c1   : > { %v1127_v13 = vrot.slane %v3360_v28, 6  ;;  %v3365_v46 = vld [vmem:[#allocation2] sm:$0xfc]  ;;  %v1126_v55 = vrot.slane %v3362_v29, 6  ;;  %v3368_v32 = vld [vmem:[#allocation2 + $0x8] sm:$0xfc] }
 0x2c2   : > { %v1029_v31 = vld [vmem:[#allocation2] sm:$0xfe] }
 0x2c3   : > { %1441 = vst.msk [vmem:[#allocation2] sm:$0xff] %vm943_vm7, %v3050_v12  ;;  %v1149_v51 = vsub.f32 %v3368_v32, %v1127_v13  ;;  %v3375_v35 = vsub.f32 %v3365_v46, %v1126_v55  ;;  %v1131_v36 = vsel %vm1125_vm13, %v1127_v13, %v1130_v33  ;;  %v1037_v5 = vmul.f32 2.0, %v1029_v31 }
 0x2c4   : > { %1446 = vst.msk [vmem:[#allocation2] sm:$0xff] %vm997_vm10, %v3050_v12  ;;  %v3382_v38 = vld [vmem:[#allocation2 + $0x28] sm:$0xff]  ;;  %v3384_v39 = vld [vmem:[#allocation2 + $0x20] sm:$0xff]  ;;  %v1151_v42 = vsub.f32 %v3358_v27, %v1131_v36  ;;  %v1091_v13 = vrot.slane %v3365_v46, 2 }
 0x2c5   : > { %v3379_v47 = vld [vmem:[#allocation2 + $0x10] sm:$0xff]  ;;  %1234 = vrot.lane.b32.xlu1 %v1149_v51, %s3051_s7  ;;  %1232 = vrot.lane.b32.xlu0 %v3375_v35, %s3051_s7  ;;  %v1134_v41 = vrot.slane %v3382_v38, 6  ;;  %v1132_v10 = vrot.slane %v3384_v39, 6  ;;  %1443 = vst.msk [vmem:[#allocation2 + $0x20] sm:$0xff] %vm943_vm7, %v3050_v12  ;;  %v1181_v60 = vmul.f32 2.0, %v1149_v51  ;;  %v1180_v37 = vmul.f32 2.0, %v3375_v35 }
 0x2c6   : > { %1442 = vst.msk [vmem:[#allocation2 + $0x10] sm:$0xff] %vm943_vm7, %v3050_v12  ;;  %v1128_v40 = vrot.slane %v3379_v47, 6  ;;  %v1027_v44 = vld [vmem:[#allocation2 + $0x30] sm:$0x3]  ;;  %v1183_v14 = vmul.f32 2.0, %v1151_v42  ;;  %v1039_v1 = vmul.f32 2.0, %v3379_v47 }
 0x2c7   : > { %1447 = vst.msk [vmem:[#allocation2 + $0x10] sm:$0xff] %vm997_vm10, %v3050_v12  ;;  %1448 = vst.msk [vmem:[#allocation2 + $0x20] sm:$0xff] %vm997_vm10, %v3050_v12  ;;  %v3402_v16 = vld [vmem:[#allocation2 + $0x30] sm:$0xf]  ;;  %v1135_v49 = vsel %vm1125_vm13, %v1130_v33, %v1134_v41  ;;  %v1136_v62 = vrot.slane %v1027_v44, 6  ;;  %v1139_v0 = vsel %vm1125_vm13, %v1134_v41, %v1138_v34  ;;  %v1041_v2 = vmul.f32 2.0, %v3384_v39 }
 0x2c8   : > { %v1129_v43 = vsel %vm1125_vm13, %v1126_v55, %v1128_v40  ;;  %v1031_v45 = vld [vmem:[#allocation2 + $0x30] sm:$0x7]  ;;  %v1133_v50 = vsel %vm1125_vm13, %v1128_v40, %v1132_v10  ;;  %v1153_v52 = vsub.f32 %v3382_v38, %v1135_v49  ;;  %v1101_v63 = vrot.slane %v3402_v16, 2 }
 0x2c9   : > { %v3405_v48 = vsub.f32 %v3379_v47, %v1129_v43  ;;  %1445 = vst.msk [vmem:[#allocation2 + $0x30] sm:$0x3] %vm1444_vm14, %v3050_v12  ;;  %1238 = vrot.lane.b32.xlu1 %v1151_v42, %s3051_s7  ;;  %v3417_v53 = vsub.f32 %v3384_v39, %v1133_v50  ;;  %v1043_v57 = vmul.f32 2.0, %v1031_v45  ;;  %v1137_v3 = vsel %vm1125_vm13, %v1132_v10, %v1136_v62 }
 0x2ca   : > { %1450 = vst.msk [vmem:[#allocation2 + $0x30] sm:$0x3] %vm1449_vm15, %v3050_v12  ;;  %v1185_v59 = vmul.f32 2.0, %v1153_v52  ;;  %v1155_v4 = vsub.f32 %v3438_v56, %v1139_v0  ;;  %v3443_v8 = vsub.f32 %v3402_v16, %v1137_v3  ;;  %v1054_v9 = vrot.slane %v1039_v1, 1 }
 0x2cb   : > { %1236 = vrot.lane.b32.xlu0 %v3405_v48, %s3051_s7  ;;  %v1063_v58 = vrot.slane %v1043_v57, 1  ;;  %v1182_v19 = vmul.f32 2.0, %v3405_v48  ;;  %v1184_v7 = vmul.f32 2.0, %v3417_v53  ;;  %v1059_v11 = vrot.slane %v1041_v2, 1 }
 0x2cc   : > { %v1187_v15 = vmul.f32 2.0, %v1155_v4  ;;  %v1053_v54 = vrot.slane %v1037_v5, 1  ;;  %v1186_v17 = vmul.f32 2.0, %v3443_v8  ;;  %v1092_v22 = vrot.slane %v3379_v47, 2 }
 0x2cd   : > { %1242 = vrot.lane.b32.xlu1 %v1153_v52, %s3051_s7  ;;  %v1081_v24 = vadd.f32 %v1063_v58, %v1027_v44  ;;  %v1060_v18 = vsel %vm677_vm2, %v1054_v9, %v1059_v11  ;;  %v1097_v23 = vrot.slane %v3384_v39, 2  ;;  %v1064_v55 = vsel %vm677_vm2, %v1059_v11, %v1063_v58 }
 0x2ce   : > { %v1055_v21 = vsel %vm677_vm2, %v1053_v54, %v1054_v9  ;;  %v1077_v25 = vadd.f32 %v1060_v18, %v3379_v47  ;;  %v1093_v51 = vsel %vm630_vm0, %v1091_v13, %v1092_v22  ;;  %v1079_v47 = vadd.f32 %v1064_v55, %v3384_v39 }
 0x2cf   : > { %1240 = vrot.lane.b32.xlu0 %v3417_v53, %s3051_s7  ;;  %v3429_v30 = vadd.f32 %v1101_v63, %v1081_v24  ;;  %v1075_v26 = vadd.f32 %v1055_v21, %v3362_v29  ;;  %v1098_v31 = vsel %vm630_vm0, %v1092_v22, %v1097_v23  ;;  %v1102_v29 = vsel %vm630_vm0, %v1097_v23, %v1101_v63 }
 0x2d0   : > { %v3465_v33 = vadd.f32 %v1098_v31, %v1077_v25  ;;  %v3476_v46 = vadd.f32 %v1102_v29, %v1079_v47  ;;  %v1030_v29 = vld [vmem:[#allocation2 + $0x8] sm:$0xfe] }
 0x2d1   : > { %1198 = vrot.lane.b32.xlu1 %v1181_v60, %s3053_s9  ;;  %v3468_v36 = vadd.f32 %v1093_v51, %v1075_v26 }
 0x2d3   : > { %1196 = vrot.lane.b32.xlu0 %v1180_v37, %s3053_s9 }
 0x2d5   : > { %1202 = vrot.lane.b32.xlu1 %v1183_v14, %s3053_s9 }
 0x2d7   : > { %1200 = vrot.lane.b32.xlu0 %v1182_v19, %s3053_s9 }
 0x2d9   : > { %1206 = vrot.lane.b32.xlu1 %v1185_v59, %s3053_s9 }
 0x2db   : > { %1204 = vrot.lane.b32.xlu0 %v1184_v7, %s3053_s9 }
 0x2dd   : > { %1210 = vrot.lane.b32.xlu1 %v1187_v15, %s3053_s9 }
 0x2df   : > { %1208 = vrot.lane.b32.xlu0 %v1186_v17, %s3053_s9 }
 0x2e1   : > { %1246 = vrot.lane.b32.xlu1 %v1155_v4, %s3051_s7 }
 0x2e3   : > { %1244 = vrot.lane.b32.xlu0 %v3443_v8, %s3051_s7 }
 0x2e5   : > { %1162 = vrot.lane.b32.xlu1 %v3465_v33, %s3055_s11 }
 0x2e7   : > { %1160 = vrot.lane.b32.xlu0 %v3468_v36, %s3055_s11 }
 0x2eb   : > { %1164 = vrot.lane.b32.xlu0 %v3476_v46, %s3055_s11 }
 0x337   : > { %v1235_v40 = vpop.permute.xlu1 %1234  ;;  %v1233_v41 = vpop.permute.xlu0 %1232 }
 0x338   : > { %v1248_v50 = vsel %vm815_vm3, %v1233_v41, %v1235_v40  ;;  %v1038_v40 = vmul.f32 2.0, %v1030_v29  ;;  %v1040_v41 = vmul.f32 2.0, %v3358_v27 }
 0x33b   : > { %v1239_v10 = vpop.permute.xlu1 %1238 }
 0x33d   : > { %v1237_v42 = vpop.permute.xlu0 %1236 }
 0x33e   : > { %v1249_v24 = vsel %vm815_vm3, %v1237_v42, %v1239_v10  ;;  %v1042_v10 = vmul.f32 2.0, %v3382_v38  ;;  %v1056_v42 = vrot.slane %v1038_v40, 1 }
 0x33f   : > { %v1243_v43 = vpop.permute.xlu1 %1242 }
 0x341   : > { %v1241_v39 = vpop.permute.xlu0 %1240 }
 0x342   : > { %v1250_v2 = vsel %vm815_vm3, %v1241_v39, %v1243_v43  ;;  %v1057_v43 = vrot.slane %v1040_v41, 1  ;;  %v1061_v39 = vrot.slane %v1042_v10, 1 }
 0x343   : > { %v1199_v44 = vpop.permute.xlu1 %1198 }
 0x345   : > { %v1197_v16 = vpop.permute.xlu0 %1196 }
 0x346   : > { %v1212_v45 = vsel %vm868_vm5, %v1197_v16, %v1199_v44  ;;  %v1058_v44 = vsel %vm677_vm2, %v1056_v42, %v1057_v43  ;;  %v1094_v16 = vrot.slane %v3368_v32, 2 }
 0x347   : > { %v1220_v49 = vadd.f32 %v1212_v45, %v3375_v35  ;;  %v1203_v52 = vpop.permute.xlu1 %1202  ;;  %v1076_v45 = vadd.f32 %v1058_v44, %v3360_v28 }
 0x349   : > { %v3483_v57 = vadd.f32 %v1248_v50, %v1220_v49  ;;  %v1201_v58 = vpop.permute.xlu0 %1200  ;;  %v3535_v49 = vmul.f32 2.0, %v3447_v6  ;;  %v1062_v50 = vsel %vm677_vm2, %v1057_v43, %v1061_v39 }
 0x34a   : > { %v1213_v60 = vsel %vm868_vm5, %v1201_v58, %v1203_v52  ;;  %v1095_v52 = vrot.slane %v3358_v27, 2  ;;  %v1099_v58 = vrot.slane %v3382_v38, 2 }
 0x34b   : > { %v1221_v37 = vadd.f32 %v1213_v60, %v3405_v48  ;;  %v1207_v62 = vpop.permute.xlu1 %1206  ;;  %v1268_v14 = vmul.f32 %v3483_v57, %v3483_v57  ;;  %v1614_v48 = vrot.slane %v3483_v57, 2 }
 0x34c   : > { %v1096_v60 = vsel %vm630_vm0, %v1094_v16, %v1095_v52 }
 0x34d   : > { %v3488_v63 = vadd.f32 %v1249_v24, %v1221_v37  ;;  %v1205_v34 = vpop.permute.xlu0 %1204  ;;  %v1276_v5 = vrot.slane %v1268_v14, 2  ;;  %v1078_v24 = vadd.f32 %v1062_v50, %v3358_v27  ;;  %v1100_v14 = vsel %vm630_vm0, %v1095_v52, %v1099_v58 }
 0x34e   : > { %v1214_v35 = vsel %vm868_vm5, %v1205_v34, %v1207_v62  ;;  %v1114_v62 = vadd.f32 %v1096_v60, %v1076_v45  ;;  %v1065_v34 = vrot.slane %v3535_v49, 1  ;;  %v1103_v27 = vrot.slane %v3438_v56, 2 }
 0x34f   : > { %v1222_v19 = vadd.f32 %v1214_v35, %v3417_v53  ;;  %v1269_v0 = vmul.f32 %v3488_v63, %v3488_v63  ;;  %v1615_v1 = vrot.slane %v3488_v63, 2  ;;  %v1211_v3 = vpop.permute.xlu1 %1210 }
 0x350   : > { %v1066_v6 = vsel %vm677_vm2, %v1061_v39, %v1065_v34 }
 0x351   : > { %v3499_v59 = vadd.f32 %v1250_v2, %v1222_v19  ;;  %v1209_v4 = vpop.permute.xlu0 %1208  ;;  %v1277_v7 = vrot.slane %v1269_v0, 2  ;;  %v3502_v9 = vsel %vm630_vm0, %v1614_v48, %v1615_v1  ;;  %v1116_v19 = vadd.f32 %v1100_v14, %v1078_v24 }
 0x352   : > { %v1215_v53 = vsel %vm868_vm5, %v1209_v4, %v1211_v3  ;;  %v1080_v0 = vadd.f32 %v1066_v6, %v3382_v38 }
 0x353   : > { %v1278_v11 = vsel %vm630_vm0, %v1276_v5, %v1277_v7  ;;  %v1270_v15 = vmul.f32 %v3499_v59, %v3499_v59  ;;  %v1617_v54 = vrot.slane %v3499_v59, 2  ;;  %v1247_v17 = vpop.permute.xlu1 %1246  ;;  %v1223_v18 = vadd.f32 %v1215_v53, %v3443_v8 }
 0x354   : > { %1283 = vrot.lane.b32.xlu1 %v1278_v11, %s3055_s11  ;;  %v1104_v5 = vsel %vm630_vm0, %v1099_v58, %v1103_v27 }
 0x355   : > { %v1245_v21 = vpop.permute.xlu0 %1244  ;;  %v1279_v22 = vrot.slane %v1270_v15, 2  ;;  %v3512_v23 = vsel %vm630_vm0, %v1615_v1, %v1617_v54  ;;  %v1118_v53 = vadd.f32 %v1104_v5, %v1080_v0 }
 0x356   : > { %v1251_v25 = vsel %vm815_vm3, %v1245_v21, %v1247_v17 }
 0x357   : > { %v3515_v26 = vadd.f32 %v1251_v25, %v1223_v18  ;;  %v1280_v13 = vsel %vm630_vm0, %v1277_v7, %v1279_v22  ;;  %v1163_v35 = vpop.permute.xlu1 %1162 }
 0x358   : > { %1285 = vrot.lane.b32.xlu0 %v1280_v13, %s3055_s11  ;;  %v3555_v1 = vsub.f32 %v3465_v33, %v1163_v35  ;;  %v3557_v48 = vsub.f32 %v1116_v19, %v1163_v35 }
 0x359   : > { %v1271_v55 = vmul.f32 %v3515_v26, %v3515_v26  ;;  %v1619_v31 = vrot.slane %v3515_v26, 2  ;;  %v1161_v37 = vpop.permute.xlu0 %1160 }
 0x35a   : > { %v3544_v32 = vsub.f32 %v3468_v36, %v1161_v37  ;;  %v3546_v28 = vsub.f32 %v1114_v62, %v1161_v37  ;;  %v1262_v15 = vmul.f32 %v3555_v1, %v3555_v1 }
 0x35b   : > { %v1281_v51 = vrot.slane %v1271_v55, 2  ;;  %v3526_v47 = vsel %vm630_vm0, %v1617_v54, %v1619_v31  ;;  %v1263_v54 = vmul.f32 %v3557_v48, %v3557_v48 }
 0x35c   : > { %v1260_v36 = vmul.f32 %v3544_v32, %v3544_v32  ;;  %v1261_v2 = vmul.f32 %v3546_v28, %v3546_v28 }
 0x35d   : > { %v1282_v8 = vsel %vm630_vm0, %v1279_v22, %v1281_v51  ;;  %v1165_v3 = vpop.permute.xlu0 %1164 }
 0x35e   : > { %1287 = vrot.lane.b32.xlu1 %v1282_v8, %s3055_s11  ;;  %v3571_v17 = vsub.f32 %v3476_v46, %v1165_v3  ;;  %v3573_v21 = vsub.f32 %v1118_v53, %v1165_v3 }
 0x360   : > { %v1264_v51 = vmul.f32 %v3571_v17, %v3571_v17  ;;  %v1265_v8 = vmul.f32 %v3573_v21, %v3573_v21 }
 0x3c6   : > { %v1284_v4 = vpop.permute.xlu1 %1283 }
 0x3c7   : > { %v1295_v38 = vadd.f32 %v1284_v4, %v1260_v36  ;;  %v1296_v7 = vadd.f32 %v1284_v4, %v1261_v2 }
 0x3c9   : > { %v1303_v11 = vadd.f32 1e-06, %v1295_v38  ;;  %v1304_v33 = vadd.f32 1e-06, %v1296_v7 }
 0x3ca   : > { %v1286_v18 = vpop.permute.xlu0 %1285 }
 0x3cb   : > { %2998 = vrsqrt.f32 %v1303_v11  ;;  %v1297_v22 = vadd.f32 %v1286_v18, %v1262_v15  ;;  %v1298_v25 = vadd.f32 %v1286_v18, %v1263_v54  ;;  %vm1313_vm4 = vcmp.eq.f32.partialorder %v1303_v11, inf }
 0x3cc   : > { %3000 = vrsqrt.f32 %v1304_v33  ;;  %v1316_v16 = vand.u32 2147483648, %v1303_v11  ;;  %vm1320_vm8 = vcmp.eq.f32.partialorder %v1304_v33, inf  ;;  %v1323_v45 = vand.u32 2147483648, %v1304_v33 }
 0x3cd   : > { %v1305_v13 = vadd.f32 1e-06, %v1297_v22  ;;  %v1306_v55 = vadd.f32 1e-06, %v1298_v25  ;;  %vm1315_vm9 = vcmp.eq.f32.partialorder %v1303_v11, 0.0  ;;  %vm1322_vm10 = vcmp.eq.f32.partialorder %v1304_v33, 0.0 }
 0x3ce   : > { %v1368_v18 = vshrl.u32 %v1009_v20, 7  ;;  %v1373_v22 = vand.u32 127, %v1009_v20 }
 0x3cf   : > { %3002 = vrsqrt.f32 %v1305_v13  ;;  %vm1327_vm11 = vcmp.eq.f32.partialorder %v1305_v13, inf  ;;  %v1330_v14 = vand.u32 2147483648, %v1305_v13  ;;  %vm1334_vm12 = vcmp.eq.f32.partialorder %v1306_v55, inf }
 0x3d0   : > { %3004 = vrsqrt.f32 %v1306_v55  ;;  %v1288_v29 = vpop.permute.xlu1 %1287  ;;  %v1337_v35 = vand.u32 2147483648, %v1306_v55  ;;  %vm1329_vm15 = vcmp.eq.f32.partialorder %v1305_v13, 0.0  ;;  %vm1336_vm1 = vcmp.eq.f32.partialorder %v1306_v55, 0.0 }
 0x3d1   : > { %v1299_v46 = vadd.f32 %v1288_v29, %v1264_v51  ;;  %v1300_v40 = vadd.f32 %v1288_v29, %v1265_v8  ;;  %v1370_v8 = vadd.s32 16, %v1368_v18 }
 0x3d3   : > { %v1307_v41 = vadd.f32 1e-06, %v1299_v46  ;;  %v1308_v10 = vadd.f32 1e-06, %v1300_v40 }
 0x3d5   : > { %3006 = vrsqrt.f32 %v1307_v41  ;;  %v1344_v7 = vand.u32 2147483648, %v1307_v41  ;;  %v1351_v53 = vand.u32 2147483648, %v1308_v10 }
 0x3d6   : > { %3008 = vrsqrt.f32 %v1308_v10 }
 0x3d8   : > { %v2999_v42 = vpop.eup %2998 }
 0x3d9   : > { %v3001_v43 = vpop.eup %3000  ;;  %v1312_v39 = vmul.f32 %v2999_v42, %v1303_v11 }
 0x3da   : > { %v1319_v44 = vmul.f32 %v3001_v43, %v1304_v33 }
 0x3db   : > { %v1314_v50 = vsel %vm1313_vm4, %v1303_v11, %v1312_v39  ;;  %vm1341_vm4 = vcmp.eq.f32.partialorder %v1307_v41, inf }
 0x3dc   : > { %v3003_v52 = vpop.eup %3002  ;;  %v1321_v58 = vsel %vm1320_vm8, %v1304_v33, %v1319_v44  ;;  %v1317_v60 = vsel %vm1315_vm9, %v1316_v16, %v1314_v50  ;;  %vm1348_vm8 = vcmp.eq.f32.partialorder %v1308_v10, inf  ;;  %vm1343_vm9 = vcmp.eq.f32.partialorder %v1307_v41, 0.0 }
 0x3dd   : > { %v3005_v37 = vpop.eup %3004  ;;  %v1324_v24 = vsel %vm1322_vm10, %v1323_v45, %v1321_v58  ;;  %1413 = vrot.lane.b32.xlu0 %v1317_v60, %s3051_s7  ;;  %v1326_v62 = vmul.f32 %v3003_v52, %v1305_v13  ;;  %vm1350_vm10 = vcmp.eq.f32.partialorder %v1308_v10, 0.0 }
 0x3de   : > { %1415 = vrot.lane.b32.xlu1 %v1324_v24, %s3051_s7  ;;  %v1333_v6 = vmul.f32 %v3005_v37, %v1306_v55 }
 0x3df   : > { %v1328_v19 = vsel %vm1327_vm11, %v1305_v13, %v1326_v62  ;;  %vm1451_vm11 = vcmask 15368  }
 0x3e0   : > { %v1335_v0 = vsel %vm1334_vm12, %v1306_v55, %v1333_v6  ;;  %v1331_v36 = vsel %vm1329_vm15, %v1330_v14, %v1328_v19  ;;  %1452 = vst.msk [vmem:[#allocation2 + $0x8] sm:$0xff] %vm1451_vm11, %v3050_v12  ;;  %1453 = vst.msk [vmem:[#allocation2 + $0x18] sm:$0xff] %vm1451_vm11, %v3050_v12  ;;  %vm1376_vm12 = vcmp.ge.s32.totalorder %v1368_v18, 5  ;;  %vm1390_vm15 = vcmp.lt.s32.totalorder %v1373_v22, 16 }
 0x3e1   : > { %v1338_v2 = vsel %vm1336_vm1, %v1337_v35, %v1335_v0  ;;  %1417 = vrot.lane.b32.xlu0 %v1331_v36, %s3051_s7  ;;  %1454 = vst.msk [vmem:[#allocation2 + $0x28] sm:$0xff] %vm1451_vm11, %v3050_v12  ;;  %vm1401_vm1 = vmand %vm1376_vm12, %vm1390_vm15 }
 0x3e2   : > { %v3007_v3 = vpop.eup %3006  ;;  %1419 = vrot.lane.b32.xlu1 %v1338_v2, %s3051_s7 }
 0x3e3   : > { %v3009_v4 = vpop.eup %3008  ;;  %v1340_v5 = vmul.f32 %v3007_v3, %v1307_v41 }
 0x3e4   : > { %v1347_v38 = vmul.f32 %v3009_v4, %v1308_v10 }
 0x3e5   : > { %v1342_v11 = vsel %vm1341_vm4, %v1307_v41, %v1340_v5  ;;  %vm1384_vm4 = vcmp.lt.s32.totalorder %v1370_v8, 21 }
 0x3e6   : > { %v1349_v33 = vsel %vm1348_vm8, %v1308_v10, %v1347_v38  ;;  %v1345_v15 = vsel %vm1343_vm9, %v1344_v7, %v1342_v11  ;;  %vm1403_vm8 = vmand %vm1384_vm4, %vm1390_vm15  ;;  %vm1479_vm9 = vcmask 1041416  }
 0x3e7   : > { %v1352_v54 = vsel %vm1350_vm10, %v1351_v53, %v1349_v33  ;;  %1421 = vrot.lane.b32.xlu0 %v1345_v15, %s3051_s7  ;;  %vm1741_vm10 = vcmask 1040384  }
 0x3e8   : > { %1423 = vrot.lane.b32.xlu1 %v1352_v54, %s3051_s7 }
 0x44f   : > { %v1414_v25 = vpop.permute.xlu0 %1413 }
 0x450   : > { %v1416_v13 = vpop.permute.xlu1 %1415 }
 0x451   : > { %v1429_v55 = vsel %vm815_vm3, %v1414_v25, %v1416_v13 }
 0x452   : > { %v1437_v51 = vsel %vm1401_vm1, %v1429_v55, 0.0 }
 0x453   : > { %1461 = vrot.lane.b32.xlu0 %v1437_v51, %s3054_s10  ;;  %v1418_v29 = vpop.permute.xlu0 %1417 }
 0x454   : > { %v1420_v46 = vpop.permute.xlu1 %1419 }
 0x455   : > { %v1430_v40 = vsel %vm815_vm3, %v1418_v29, %v1420_v46 }
 0x456   : > { %v1438_v41 = vsel %vm1390_vm15, %v1430_v40, 0.0 }
 0x457   : > { %1463 = vrot.lane.b32.xlu1 %v1438_v41, %s3054_s10 }
 0x459   : > { %v1422_v20 = vpop.permute.xlu0 %1421 }
 0x45a   : > { %v1424_v10 = vpop.permute.xlu1 %1423 }
 0x45b   : > { %v1431_v42 = vsel %vm815_vm3, %v1422_v20, %v1424_v10  ;;  %1467 = vrot.lane.b32.xlu1 %v3050_v12, %s3054_s10 }
 0x45c   : > { %v1439_v43 = vsel %vm1403_vm8, %v1431_v42, 0.0 }
 0x45d   : > { %1465 = vrot.lane.b32.xlu0 %v1439_v43, %s3054_s10 }
 0x4c5   : > { %v1462_v39 = vpop.permute.xlu0 %1461 }
 0x4c6   : > { %1473 = vst.msk [vmem:[#allocation2] sm:$0xff] %vm941_vm6, %v1462_v39 }
 0x4c7   : > { %1474 = vst.msk [vmem:[#allocation2 + $0x8] sm:$0xff] %vm943_vm7, %v1462_v39 }
 0x4c9   : > { %v1464_v44 = vpop.permute.xlu1 %1463 }
 0x4ca   : > { %1475 = vst.msk [vmem:[#allocation2 + $0x10] sm:$0xff] %vm941_vm6, %v1464_v44 }
 0x4cb   : > { %1476 = vst.msk [vmem:[#allocation2 + $0x18] sm:$0xff] %vm943_vm7, %v1464_v44 }
 0x4cd   : > { %v1468_v16 = vpop.permute.xlu1 %1467  ;;  %v1691_v50 = vld [vmem:[#allocation2] sm:$0xfc] }
 0x4ce   : > { %1481 = vst.msk [vmem:[#allocation2 + $0x38] sm:$0x3] %vm1444_vm14, %v1468_v16  ;;  %v1692_v12 = vld [vmem:[#allocation2 + $0x8] sm:$0xfc]  ;;  %v1703_v24 = vrot.slane %v1691_v50, 2  ;;  %v3625_v38 = vld [vmem:[#allocation2] sm:$0xff] }
 0x4cf   : > { %1480 = vst.msk [vmem:[#allocation2 + $0x30] sm:$0x3] %vm1479_vm9, %v1468_v16  ;;  %v1466_v45 = vpop.permute.xlu0 %1465  ;;  %v1706_v60 = vrot.slane %v1692_v12, 2  ;;  %v3618_v2 = vld [vmem:[#allocation2 + $0x8] sm:$0xff]  ;;  %vm1809_vm14 = vcmask 1042432  }
 0x4d0   : > { %1477 = vst.msk [vmem:[#allocation2 + $0x20] sm:$0xff] %vm941_vm6, %v1466_v45  ;;  %v3671_v39 = vld [vmem:[#allocation2 + $0x8] sm:$0xfe]  ;;  %v3677_v44 = vld [vmem:[#allocation2] sm:$0xfe] }
 0x4d1   : > { %1478 = vst.msk [vmem:[#allocation2 + $0x28] sm:$0xff] %vm943_vm7, %v1466_v45  ;;  %v3610_v58 = vld [vmem:[#allocation2 + $0x10] sm:$0xff] }
 0x4d2   : > { %v3608_v52 = vld [vmem:[#allocation2 + $0x18] sm:$0xff]  ;;  %v1704_v62 = vrot.slane %v3610_v58, 2 }
 0x4d3   : > { %v1707_v37 = vrot.slane %v3608_v52, 2 }
 0x4d4   : > { %v1705_v14 = vsel %vm630_vm0, %v1703_v24, %v1704_v62 }
 0x4d5   : > { %v1708_v6 = vsel %vm630_vm0, %v1706_v60, %v1707_v37  ;;  %1717 = vrot.lane.b32.xlu0 %v1705_v14, %s3051_s7  ;;  %v1694_v35 = vld [vmem:[#allocation2 + $0x38] sm:$0x3]  ;;  %v1797_v11 = vmax.f32 %v3625_v38, %v1705_v14 }
 0x4d6   : > { %1719 = vrot.lane.b32.xlu1 %v1708_v6, %s3051_s7  ;;  %v1693_v19 = vld [vmem:[#allocation2 + $0x30] sm:$0x3]  ;;  %v1715_v0 = vrot.slane %v1694_v35, 2  ;;  %v1798_v5 = vmax.f32 %v3618_v2, %v1708_v6 }
 0x4d7   : > { %v1713_v36 = vrot.slane %v1693_v19, 2  ;;  %v3622_v4 = vld [vmem:[#allocation2 + $0x20] sm:$0xff]  ;;  %v3642_v8 = vrot.slane %v1797_v11, 5  ;;  %v3694_v45 = vld [vmem:[#allocation2 + $0x30] sm:$0x1] }
 0x4d8   : > { %v3620_v3 = vld [vmem:[#allocation2 + $0x28] sm:$0xff]  ;;  %v1709_v53 = vrot.slane %v3622_v4, 2  ;;  %v3639_v55 = vrot.slane %v1798_v5, 5  ;;  %v1484_v11 = vand.u32 2147483647, %v3555_v1 }
 0x4d9   : > { %v1711_v7 = vrot.slane %v3620_v3, 2 }
 0x4da   : > { %v1710_v15 = vsel %vm630_vm0, %v1704_v62, %v1709_v53  ;;  %v1714_v18 = vsel %vm630_vm0, %v1709_v53, %v1713_v36  ;;  %v1554_v49 = vmul.f32 2.4142137, %v1484_v11 }
 0x4db   : > { %v1712_v33 = vsel %vm630_vm0, %v1707_v37, %v1711_v7  ;;  %v1716_v54 = vsel %vm630_vm0, %v1711_v7, %v1715_v0  ;;  %1721 = vrot.lane.b32.xlu0 %v1710_v15, %s3051_s7  ;;  %v1799_v25 = vmax.f32 %v3610_v58, %v1710_v15  ;;  %v1801_v51 = vmax.f32 %v3622_v4, %v1714_v18 }
 0x4dc   : > { %1723 = vrot.lane.b32.xlu1 %v1712_v33, %s3051_s7  ;;  %v1800_v22 = vmax.f32 %v3608_v52, %v1712_v33  ;;  %v1802_v13 = vmax.f32 %v3620_v3, %v1716_v54  ;;  %v1482_v7 = vand.u32 2147483647, %v3544_v32 }
 0x4dd   : > { %v1812_v46 = vrot.slane %v1799_v25, 5  ;;  %v3646_v41 = vrot.slane %v1801_v51, 5 }
 0x4de   : > { %v1814_v29 = vrot.slane %v1800_v22, 5  ;;  %v3644_v40 = vrot.slane %v1802_v13, 5  ;;  %v1552_v51 = vmul.f32 2.4142137, %v1482_v7 }
 0x4df   : > { %1725 = vrot.lane.b32.xlu0 %v1714_v18, %s3051_s7  ;;  %v3651_v20 = vsel %vm1809_vm14, %v3642_v8, %v1812_v46  ;;  %v3660_v43 = vsel %vm1809_vm14, %v1812_v46, %v3646_v41  ;;  %v1483_v18 = vand.u32 2147483647, %v3546_v28 }
 0x4e0   : > { %1727 = vrot.lane.b32.xlu1 %v1716_v54, %s3051_s7  ;;  %v3654_v10 = vsel %vm1809_vm14, %v3639_v55, %v1814_v29  ;;  %v3657_v42 = vsel %vm1809_vm14, %v1814_v29, %v3644_v40  ;;  %v1485_v54 = vand.u32 2147483647, %v3557_v48  ;;  %v1486_v29 = vand.u32 2147483647, %v3571_v17 }
 0x4e3   : > { %1166 = vrot.lane.b32.xlu0 %v3429_v30, %s3055_s11 }
 0x4e4   : > { %1623 = vrot.lane.b32.xlu1 %v3512_v23, %s3055_s11  ;;  %v3687_v23 = vld [vmem:[#allocation2 + $0x38] sm:$0x1] }
 0x4e7   : > { %1621 = vrot.lane.b32.xlu0 %v3502_v9, %s3055_s11  ;;  %v1663_v9 = vld [vmem:[#allocation2] sm:$0xfc] }
 0x4e8   : > { %1627 = vrot.lane.b32.xlu1 %v1619_v31, %s3055_s11  ;;  %v1664_v31 = vld [vmem:[#allocation2 + $0x30] sm:$0x3] }
 0x4e9   : > { %v1674_v12 = vrot.slane %v1664_v31, 2  ;;  %v1555_v31 = vmul.f32 2.4142137, %v1485_v54 }
 0x4eb   : > { %1625 = vrot.lane.b32.xlu0 %v3526_v47, %s3055_s11  ;;  %v1669_v47 = vrot.slane %v1663_v9, 2  ;;  %v1675_v50 = vsel %vm630_vm0, %v1709_v53, %v1674_v12 }
 0x4ec   : > { %1902 = vrot.lane.b32.xlu1 %v3671_v39, %s3051_s7 }
 0x4ed   : > { %v1671_v16 = vsel %vm630_vm0, %v1669_v47, %v1704_v62  ;;  %v1487_v47 = vand.u32 2147483647, %v3573_v21 }
 0x4ef   : > { %1900 = vrot.lane.b32.xlu0 %v3677_v44, %s3051_s7 }
 0x4f0   : > { %1906 = vrot.lane.b32.xlu1 %v3608_v52, %s3051_s7 }
 0x4f3   : > { %1904 = vrot.lane.b32.xlu0 %v3610_v58, %s3051_s7 }
 0x4f4   : > { %1910 = vrot.lane.b32.xlu1 %v3620_v3, %s3051_s7 }
 0x4f7   : > { %1908 = vrot.lane.b32.xlu0 %v3622_v4, %s3051_s7 }
 0x4f8   : > { %1914 = vrot.lane.b32.xlu1 %v3687_v23, %s3051_s7 }
 0x4fb   : > { %1912 = vrot.lane.b32.xlu0 %v3694_v45, %s3051_s7 }
 0x4fc   : > { %1676 = vrot.lane.b32.xlu1 %v1671_v16, %s3055_s11 }
 0x4ff   : > { %1678 = vrot.lane.b32.xlu0 %v1710_v15, %s3055_s11  ;;  %v1082_v15 = vadd.f32 %v1065_v34, %v3422_v61  ;;  %v1553_v34 = vmul.f32 2.4142137, %v1483_v18 }
 0x500   : > { %1680 = vrot.lane.b32.xlu1 %v1675_v50, %s3055_s11 }
 0x501   : > { %v1120_v61 = vadd.f32 %v1103_v27, %v1082_v15  ;;  %v1569_v56 = vrot.slane %v1553_v34, 6 }
 0x547   : > { %v1718_v37 = vpop.permute.xlu0 %1717 }
 0x548   : > { %v1720_v60 = vpop.permute.xlu1 %1719 }
 0x549   : > { %v1729_v24 = vsel %vm815_vm3, %v1718_v37, %v1720_v60  ;;  %v1570_v60 = vrot.slane %v1554_v49, 6  ;;  %v1556_v37 = vmul.f32 2.4142137, %v1486_v29 }
 0x54a   : > { %v1735_v62 = vmax.f32 %v3625_v38, %v1729_v24  ;;  %v1572_v24 = vrot.slane %v1555_v31, 6  ;;  %v1498_v31 = vmul.f32 0.41421357, %v1486_v29 }
 0x54c   : > { %v1742_v6 = vrot.slane %v1735_v62, 7  ;;  %v1557_v62 = vmul.f32 2.4142137, %v1487_v47 }
 0x54d   : > { %v1722_v35 = vpop.permute.xlu0 %1721 }
 0x54e   : > { %v1724_v14 = vpop.permute.xlu1 %1723  ;;  %1747 = vrot.lane.b32.xlu0 %v1742_v6, %s3055_s11 }
 0x54f   : > { %v1730_v19 = vsel %vm815_vm3, %v1722_v35, %v1724_v14 }
 0x550   : > { %v1736_v0 = vmax.f32 %v3610_v58, %v1730_v19 }
 0x551   : > { %v1726_v5 = vpop.permute.xlu0 %1725 }
 0x552   : > { %v1728_v36 = vpop.permute.xlu1 %1727  ;;  %v1743_v22 = vrot.slane %v1736_v0, 7  ;;  %v1573_v0 = vsel %vm1125_vm13, %v1569_v56, %v1572_v24 }
 0x553   : > { %v1731_v53 = vsel %vm815_vm3, %v1726_v5, %v1728_v36  ;;  %v1576_v36 = vrot.slane %v1557_v62, 6 }
 0x554   : > { %v1737_v33 = vmax.f32 %v3622_v4, %v1731_v53  ;;  %v1744_v12 = vsel %vm1741_vm10, %v1742_v6, %v1743_v22  ;;  %v1574_v6 = vrot.slane %v1556_v37, 6  ;;  %v1516_v37 = vrot.slane %v1498_v31, 6 }
 0x555   : > { %v1167_v13 = vpop.permute.xlu0 %1166 }
 0x556   : > { %v1745_v25 = vrot.slane %v1737_v33, 7  ;;  %v3718_v46 = vsub.f32 %v3429_v30, %v1167_v13  ;;  %v3726_v16 = vsub.f32 %v1120_v61, %v1167_v13  ;;  %v1568_v30 = vrot.slane %v1552_v51, 6 }
 0x557   : > { %v1575_v5 = vsel %vm1125_vm13, %v1570_v60, %v1574_v6  ;;  %v1577_v33 = vsel %vm1125_vm13, %v1572_v24, %v1576_v36  ;;  %v1496_v13 = vmul.f32 0.41421357, %v1484_v11  ;;  %v1495_v51 = vmul.f32 0.41421357, %v1483_v18 }
 0x558   : > { %1753 = vrot.lane.b32.xlu1 %v1745_v25, %s3055_s11  ;;  %v1746_v9 = vsel %vm1741_vm10, %v1743_v22, %v1745_v25  ;;  %v1488_v50 = vand.u32 2147483647, %v3718_v46  ;;  %v1489_v27 = vand.u32 2147483647, %v3726_v16  ;;  %v1571_v35 = vsel %vm1125_vm13, %v1568_v30, %v1570_v60 }
 0x559   : > { %1751 = vrot.lane.b32.xlu0 %v1746_v9, %s3055_s11  ;;  %v1494_v22 = vmul.f32 0.41421357, %v1482_v7  ;;  %v1497_v61 = vmul.f32 0.41421357, %v1485_v54  ;;  %v1512_v34 = vrot.slane %v1496_v13, 6 }
 0x55a   : > { %v1558_v14 = vmul.f32 2.4142137, %v1488_v50  ;;  %v1559_v19 = vmul.f32 2.4142137, %v1489_v27  ;;  %v1500_v60 = vmul.f32 0.41421357, %v1488_v50 }
 0x55b   : > { %v1510_v49 = vrot.slane %v1494_v22, 6  ;;  %v1514_v7 = vrot.slane %v1497_v61, 6  ;;  %v1501_v18 = vmul.f32 0.41421357, %v1489_v27  ;;  %v1517_v29 = vsel %vm1125_vm13, %v1512_v34, %v1516_v37 }
 0x55c   : > { %1749 = vrot.lane.b32.xlu1 %v1744_v12, %s3055_s11  ;;  %v1578_v53 = vrot.slane %v1558_v14, 6  ;;  %v1580_v15 = vrot.slane %v1559_v19, 6  ;;  %v1511_v12 = vrot.slane %v1495_v51, 6  ;;  %v1520_v24 = vrot.slane %v1500_v60, 6 }
 0x55d   : > { %1582 = vrot.lane.b32.xlu0 %v1568_v30, %s3051_s7  ;;  %v1499_v30 = vmul.f32 0.41421357, %v1487_v47  ;;  %v1513_v11 = vsel %vm1125_vm13, %v1510_v49, %v1512_v34  ;;  %v1522_v50 = vrot.slane %v1501_v18, 6 }
 0x55e   : > { %v1579_v25 = vsel %vm1125_vm13, %v1574_v6, %v1578_v53  ;;  %v1581_v9 = vsel %vm1125_vm13, %v1576_v36, %v1580_v15  ;;  %v1515_v54 = vsel %vm1125_vm13, %v1511_v12, %v1514_v7  ;;  %v1521_v62 = vsel %vm1125_vm13, %v1516_v37, %v1520_v24 }
 0x560   : > { %1584 = vrot.lane.b32.xlu1 %v1569_v56, %s3051_s7  ;;  %v1518_v56 = vrot.slane %v1499_v30, 6 }
 0x561   : > { %1586 = vrot.lane.b32.xlu0 %v1571_v35, %s3051_s7 }
 0x562   : > { %v1519_v47 = vsel %vm1125_vm13, %v1514_v7, %v1518_v56  ;;  %v1523_v27 = vsel %vm1125_vm13, %v1518_v56, %v1522_v50 }
 0x564   : > { %1588 = vrot.lane.b32.xlu1 %v1573_v0, %s3051_s7 }
 0x565   : > { %1590 = vrot.lane.b32.xlu0 %v1575_v5, %s3051_s7 }
 0x568   : > { %1592 = vrot.lane.b32.xlu1 %v1577_v33, %s3051_s7 }
 0x569   : > { %1594 = vrot.lane.b32.xlu0 %v1579_v25, %s3051_s7 }
 0x56c   : > { %1596 = vrot.lane.b32.xlu1 %v1581_v9, %s3051_s7 }
 0x56d   : > { %1524 = vrot.lane.b32.xlu0 %v1510_v49, %s3051_s7 }
 0x570   : > { %1526 = vrot.lane.b32.xlu1 %v1511_v12, %s3051_s7 }
 0x571   : > { %1528 = vrot.lane.b32.xlu0 %v1513_v11, %s3051_s7 }
 0x574   : > { %1530 = vrot.lane.b32.xlu1 %v1515_v54, %s3051_s7 }
 0x575   : > { %1532 = vrot.lane.b32.xlu0 %v1517_v29, %s3051_s7 }
 0x578   : > { %1534 = vrot.lane.b32.xlu1 %v1519_v47, %s3051_s7 }
 0x579   : > { %1536 = vrot.lane.b32.xlu0 %v1521_v62, %s3051_s7 }
 0x57c   : > { %1538 = vrot.lane.b32.xlu1 %v1523_v27, %s3051_s7 }
 0x57d   : > { %1820 = vrot.lane.b32.xlu0 %v3642_v8, %s3053_s9  ;;  %v1624_v8 = vpop.permute.xlu1 %1623 }
 0x57e   : > { %v1635_v31 = vmul.f32 %v1624_v8, %v3555_v1  ;;  %v1636_v12 = vmul.f32 %v1624_v8, %v3557_v48 }
 0x580   : > { %1822 = vrot.lane.b32.xlu1 %v3639_v55, %s3053_s9  ;;  %v1622_v55 = vpop.permute.xlu0 %1621  ;;  %vm1643_vm15 = vcmp.ge.f32.partialorder %v1635_v31, 0.0  ;;  %vm1644_vm1 = vcmp.ge.f32.partialorder %v1636_v12, 0.0 }
 0x581   : > { %1824 = vrot.lane.b32.xlu0 %v3651_v20, %s3053_s9  ;;  %v1628_v14 = vpop.permute.xlu1 %1627  ;;  %v1633_v53 = vmul.f32 %v1622_v55, %v3544_v32  ;;  %v1634_v33 = vmul.f32 %v1622_v55, %v3546_v28 }
 0x582   : > { %v1639_v56 = vmul.f32 %v1628_v14, %v3718_v46  ;;  %v1640_v29 = vmul.f32 %v1628_v14, %v3726_v16 }
 0x583   : > { %vm1641_vm11 = vcmp.ge.f32.partialorder %v1633_v53, 0.0  ;;  %vm1642_vm12 = vcmp.ge.f32.partialorder %v1634_v33, 0.0 }
 0x584   : > { %1826 = vrot.lane.b32.xlu1 %v3654_v10, %s3053_s9  ;;  %v1626_v35 = vpop.permute.xlu0 %1625  ;;  %vm1647_vm9 = vcmp.ge.f32.partialorder %v1639_v56, 0.0  ;;  %vm1648_vm14 = vcmp.ge.f32.partialorder %v1640_v29, 0.0 }
 0x585   : > { %1828 = vrot.lane.b32.xlu0 %v3660_v43, %s3053_s9  ;;  %v3776_v20 = vpop.permute.xlu1 %1902  ;;  %v1637_v11 = vmul.f32 %v1626_v35, %v3571_v17  ;;  %v1638_v37 = vmul.f32 %v1626_v35, %v3573_v21 }
 0x587   : > { %vm1645_vm4 = vcmp.ge.f32.partialorder %v1637_v11, 0.0  ;;  %vm1646_vm8 = vcmp.ge.f32.partialorder %v1638_v37, 0.0 }
 0x588   : > { %1830 = vrot.lane.b32.xlu1 %v3657_v42, %s3053_s9  ;;  %v3778_v6 = vpop.permute.xlu0 %1900 }
 0x589   : > { %1832 = vrot.lane.b32.xlu0 %v3646_v41, %s3053_s9  ;;  %v3780_v10 = vpop.permute.xlu1 %1906 }
 0x58c   : > { %1834 = vrot.lane.b32.xlu1 %v3644_v40, %s3053_s9  ;;  %v3782_v43 = vpop.permute.xlu0 %1904 }
 0x58d   : > { %v3784_v19 = vpop.permute.xlu1 %1910 }
 0x590   : > { %v3786_v42 = vpop.permute.xlu0 %1908 }
 0x591   : > { %v3788_v41 = vpop.permute.xlu1 %1914 }
 0x594   : > { %v3790_v0 = vpop.permute.xlu0 %1912 }
 0x595   : > { %v1677_v40 = vpop.permute.xlu1 %1676 }
 0x596   : > { %v1685_v36 = vmax.f32 %v3625_v38, %v1677_v40  ;;  %v1686_v5 = vmax.f32 %v3618_v2, %v1677_v40 }
 0x598   : > { %v1679_v15 = vpop.permute.xlu0 %1678  ;;  %v1765_v22 = vrot.slane %v1685_v36, 7  ;;  %v1766_v25 = vrot.slane %v1686_v5, 7 }
 0x599   : > { %v1681_v38 = vpop.permute.xlu1 %1680  ;;  %v1687_v2 = vmax.f32 %v3610_v58, %v1679_v15  ;;  %v1688_v32 = vmax.f32 %v3608_v52, %v1679_v15 }
 0x59a   : > { %v1689_v28 = vmax.f32 %v3622_v4, %v1681_v38  ;;  %v1690_v34 = vmax.f32 %v3620_v3, %v1681_v38 }
 0x59b   : > { %v1767_v7 = vrot.slane %v1687_v2, 7  ;;  %v1769_v30 = vrot.slane %v1688_v32, 7 }
 0x59c   : > { %v1771_v18 = vrot.slane %v1689_v28, 7  ;;  %v1773_v54 = vrot.slane %v1690_v34, 7 }
 0x59d   : > { %v1768_v1 = vsel %vm1741_vm10, %v1765_v22, %v1767_v7  ;;  %v1770_v48 = vsel %vm1741_vm10, %v1766_v25, %v1769_v30 }
 0x59e   : > { %v1772_v21 = vsel %vm1741_vm10, %v1767_v7, %v1771_v18  ;;  %v1774_v62 = vsel %vm1741_vm10, %v1769_v30, %v1773_v54 }
 0x5c0   : > { %v1748_v13 = vpop.permute.xlu0 %1747 }
 0x5c1   : > { %v1783_v51 = vsel %vm1641_vm11, %v1748_v13, %v1765_v22  ;;  %v1784_v9 = vsel %vm1642_vm12, %v1748_v13, %v1766_v25 }
 0x5c2   : > { %v1852_v49 = vrot.slane %v1783_v51, 6  ;;  %v1853_v61 = vrot.slane %v1784_v9, 6 }
 0x5c4   : > { %1868 = vrot.lane.b32.xlu1 %v1853_v61, %s3051_s7  ;;  %1866 = vrot.lane.b32.xlu0 %v1852_v49, %s3051_s7 }
 0x5ca   : > { %v1754_v60 = vpop.permute.xlu1 %1753 }
 0x5cb   : > { %v1752_v24 = vpop.permute.xlu0 %1751  ;;  %v1789_v35 = vsel %vm1647_vm9, %v1754_v60, %v1771_v18  ;;  %v1790_v40 = vsel %vm1648_vm14, %v1754_v60, %v1773_v54 }
 0x5cc   : > { %v1787_v55 = vsel %vm1645_vm4, %v1752_v24, %v1772_v21  ;;  %v1788_v46 = vsel %vm1646_vm8, %v1752_v24, %v1774_v62  ;;  %v1862_v53 = vrot.slane %v1789_v35, 6  ;;  %v1864_v33 = vrot.slane %v1790_v40, 6 }
 0x5cd   : > { %v1858_v36 = vrot.slane %v1787_v55, 6  ;;  %v1860_v5 = vrot.slane %v1788_v46, 6 }
 0x5ce   : > { %v1750_v47 = vpop.permute.xlu1 %1749 }
 0x5cf   : > { %v1785_v50 = vsel %vm1643_vm15, %v1750_v47, %v1768_v1  ;;  %v1786_v17 = vsel %vm1644_vm1, %v1750_v47, %v1770_v48  ;;  %v1865_v25 = vsel %vm1125_vm13, %v1860_v5, %v1864_v33  ;;  %v1863_v13 = vsel %vm1125_vm13, %v1858_v36, %v1862_v53  ;;  %v1583_v51 = vpop.permute.xlu0 %1582 }
 0x5d0   : > { %v1854_v27 = vrot.slane %v1785_v50, 6  ;;  %v1856_v8 = vrot.slane %v1786_v17, 6  ;;  %v1917_v50 = vsel %vm815_vm3, %v3782_v43, %v3780_v10  ;;  %v1916_v17 = vsel %vm815_vm3, %v3778_v6, %v3776_v20 }
 0x5d1   : > { %v1925_v55 = vmax.f32 %v3610_v58, %v1917_v50  ;;  %v1919_v20 = vsel %vm815_vm3, %v3790_v0, %v3788_v41  ;;  %v1491_v53 = vand.u32 2147483647, %v3488_v63  ;;  %v1492_v63 = vand.u32 2147483647, %v3499_v59 }
 0x5d2   : > { %v1857_v16 = vsel %vm1125_vm13, %v1853_v61, %v1856_v8  ;;  %v1855_v14 = vsel %vm1125_vm13, %v1852_v49, %v1854_v27  ;;  %v1861_v15 = vsel %vm1125_vm13, %v1856_v8, %v1860_v5  ;;  %v1859_v22 = vsel %vm1125_vm13, %v1854_v27, %v1858_v36  ;;  %v1585_v9 = vpop.permute.xlu1 %1584  ;;  %v1894_v8 = vld [vmem:[#allocation2] sm:$0xfe]  ;;  %v1895_v5 = vld [vmem:[#allocation2 + $0x30] sm:$0x1] }
 0x5d3   : > { %1872 = vrot.lane.b32.xlu1 %v1857_v16, %s3051_s7  ;;  %1870 = vrot.lane.b32.xlu0 %v1855_v14, %s3051_s7  ;;  %v1587_v49 = vpop.permute.xlu0 %1586  ;;  %v1918_v27 = vsel %vm815_vm3, %v3786_v42, %v3784_v19  ;;  %v1598_v46 = vsel %vm815_vm3, %v1583_v51, %v1585_v9  ;;  %v1924_v16 = vmax.f32 %v1894_v8, %v1916_v17  ;;  %v1490_v14 = vand.u32 2147483647, %v3483_v57 }
 0x5d4   : > { %v1926_v43 = vmax.f32 %v3622_v4, %v1918_v27  ;;  %v1933_v35 = vrot.slane %v1925_v55, 6  ;;  %v1927_v33 = vmax.f32 %v1895_v5, %v1919_v20 }
 0x5d5   : > { %vm3851_vm11 = vcmp.gt.f32.partialorder %v1490_v14, %v1598_v46  ;;  %v1932_v36 = vrot.slane %v1924_v16, 6 }
 0x5d6   : > { %v1589_v61 = vpop.permute.xlu1 %1588  ;;  %v1935_v0 = vrot.slane %v1926_v43, 6 }
 0x5d7   : > { %1876 = vrot.lane.b32.xlu1 %v1861_v15, %s3051_s7  ;;  %1874 = vrot.lane.b32.xlu0 %v1859_v22, %s3051_s7  ;;  %v1591_v38 = vpop.permute.xlu0 %1590  ;;  %v1599_v40 = vsel %vm815_vm3, %v1587_v49, %v1589_v61  ;;  %v1934_v9 = vsel %vm1125_vm13, %v1932_v36, %v1933_v35 }
 0x5d8   : > { %vm1607_vm15 = vcmp.gt.f32.partialorder %v1491_v53, %v1599_v40 }
 0x5da   : > { %v1593_v2 = vpop.permute.xlu1 %1592 }
 0x5db   : > { %1880 = vrot.lane.b32.xlu1 %v1865_v25, %s3051_s7  ;;  %1878 = vrot.lane.b32.xlu0 %v1863_v13, %s3051_s7  ;;  %v3824_v32 = vpop.permute.xlu0 %1594  ;;  %v1600_v49 = vsel %vm815_vm3, %v1591_v38, %v1593_v2 }
 0x5dc   : > { %vm1608_vm4 = vcmp.gt.f32.partialorder %v1492_v63, %v1600_v49 }
 0x5de   : > { %v3826_v28 = vpop.permute.xlu1 %1596 }
 0x5df   : > { %v1525_v34 = vpop.permute.xlu0 %1524  ;;  %v1601_v38 = vsel %vm815_vm3, %v3824_v32, %v3826_v28 }
 0x5e2   : > { %v1527_v31 = vpop.permute.xlu1 %1526 }
 0x5e3   : > { %v1529_v12 = vpop.permute.xlu0 %1528  ;;  %v1540_v19 = vsel %vm815_vm3, %v1525_v34, %v1527_v31 }
 0x5e4   : > { %vm1548_vm12 = vcmp.le.f32.partialorder %v1490_v14, %v1540_v19 }
 0x5e6   : > { %v1531_v7 = vpop.permute.xlu1 %1530 }
 0x5e7   : > { %v1533_v30 = vpop.permute.xlu0 %1532  ;;  %v1541_v41 = vsel %vm815_vm3, %v1529_v12, %v1531_v7  ;;  %v1936_v12 = vsel %vm1125_vm13, %v1933_v35, %v1935_v0 }
 0x5e8   : > { %vm1549_vm1 = vcmp.le.f32.partialorder %v1491_v53, %v1541_v41 }
 0x5ea   : > { %v1535_v60 = vpop.permute.xlu1 %1534 }
 0x5eb   : > { %v3828_v11 = vpop.permute.xlu0 %1536  ;;  %v1542_v34 = vsel %vm815_vm3, %v1533_v30, %v1535_v60  ;;  %v1493_v30 = vand.u32 2147483647, %v3515_v26 }
 0x5ec   : > { %vm1550_vm8 = vcmp.le.f32.partialorder %v1492_v63, %v1542_v34 }
 0x5ed   : > { %vm1609_vm9 = vcmp.gt.f32.partialorder %v1493_v30, %v1601_v38 }
 0x5ee   : > { %v3830_v37 = vpop.permute.xlu1 %1538 }
 0x5ef   : > { %v1821_v18 = vpop.permute.xlu0 %1820  ;;  %v1543_v60 = vsel %vm815_vm3, %v3828_v11, %v3830_v37 }
 0x5f0   : > { %vm1551_vm14 = vcmp.le.f32.partialorder %v1493_v30, %v1543_v60 }
 0x5f2   : > { %v1823_v54 = vpop.permute.xlu1 %1822 }
 0x5f3   : > { %v1825_v56 = vpop.permute.xlu0 %1824  ;;  %v1836_v42 = vsel %vm868_vm5, %v1821_v18, %v1823_v54 }
 0x5f6   : > { %v1827_v29 = vpop.permute.xlu1 %1826 }
 0x5f7   : > { %v1829_v24 = vpop.permute.xlu0 %1828  ;;  %v1837_v25 = vsel %vm868_vm5, %v1825_v56, %v1827_v29  ;;  %v1937_v29 = vrot.slane %v1927_v33, 6 }
 0x5f9   : > { %v1938_v27 = vsel %vm1125_vm13, %v1935_v0, %v1937_v29 }
 0x5fa   : > { %v1831_v47 = vpop.permute.xlu1 %1830 }
 0x5fb   : > { %v3832_v1 = vpop.permute.xlu0 %1832  ;;  %v1838_v50 = vsel %vm868_vm5, %v1829_v24, %v1831_v47 }
 0x5fe   : > { %v1835_v48 = vpop.permute.xlu1 %1834 }
 0x5ff   : > { %v1839_v32 = vsel %vm868_vm5, %v3832_v1, %v1835_v48 }
 0x636   : > { %v1869_v21 = vpop.permute.xlu1 %1868  ;;  %v1867_v62 = vpop.permute.xlu0 %1866 }
 0x637   : > { %v1882_v10 = vsel %vm815_vm3, %v1867_v62, %v1869_v21 }
 0x638   : > { %v1890_v57 = vsel %vm3851_vm11, %v1836_v42, %v1882_v10 }
 0x639   : > { %v1943_v13 = vsel %vm1548_vm12, %v1932_v36, %v1890_v57 }
 0x63a   : > { %v1951_v7 = vrot.slane %v1943_v13, 2 }
 0x645   : > { %v1873_v15 = vpop.permute.xlu1 %1872  ;;  %v1871_v22 = vpop.permute.xlu0 %1870 }
 0x646   : > { %v1883_v51 = vsel %vm815_vm3, %v1871_v22, %v1873_v15 }
 0x647   : > { %v1891_v61 = vsel %vm1607_vm15, %v1837_v25, %v1883_v51 }
 0x648   : > { %v1944_v31 = vsel %vm1549_vm1, %v1934_v9, %v1891_v61 }
 0x649   : > { %v1952_v18 = vrot.slane %v1944_v31, 2  ;;  %v1877_v54 = vpop.permute.xlu1 %1876  ;;  %v1875_v56 = vpop.permute.xlu0 %1874 }
 0x64a   : > { %v1884_v17 = vsel %vm815_vm3, %v1875_v56, %v1877_v54 }
 0x64b   : > { %v1892_v59 = vsel %vm1608_vm4, %v1838_v50, %v1884_v17  ;;  %v1953_v2 = vsel %vm630_vm0, %v1951_v7, %v1952_v18 }
 0x64c   : > { %v1945_v21 = vsel %vm1550_vm8, %v1936_v12, %v1892_v59  ;;  %1958 = vrot.lane.b32.xlu0 %v1953_v2, %s3054_s10 }
 0x64d   : > { %v1954_v24 = vrot.slane %v1945_v21, 2  ;;  %v1881_v47 = vpop.permute.xlu1 %1880  ;;  %v1879_v62 = vpop.permute.xlu0 %1878 }
 0x64e   : > { %v1885_v28 = vsel %vm815_vm3, %v1879_v62, %v1881_v47 }
 0x64f   : > { %v1893_v26 = vsel %vm1609_vm9, %v1839_v32, %v1885_v28  ;;  %v1955_v8 = vsel %vm630_vm0, %v1952_v18, %v1954_v24 }
 0x650   : > { %v1946_v55 = vsel %vm1551_vm14, %v1938_v27, %v1893_v26  ;;  %1960 = vrot.lane.b32.xlu1 %v1955_v8, %s3054_s10  ;;  %vm2179_vm14 = vcmask 7169  }
 0x651   : > { %v1956_v11 = vrot.slane %v1946_v55, 2 }
 0x653   : > { %v1957_v37 = vsel %vm630_vm0, %v1954_v24, %v1956_v11 }
 0x654   : > { %1964 = vrot.lane.b32.xlu1 %v1956_v11, %s3054_s10  ;;  %1962 = vrot.lane.b32.xlu0 %v1957_v37, %s3054_s10 }
 0x6be   : > { %v1959_v46 = vpop.permute.xlu0 %1958 }
 0x6bf   : > { %vm1970_vm11 = vcmp.gt.f32.partialorder %v3677_v44, %v1959_v46  ;;  %vm1971_vm12 = vcmp.gt.f32.partialorder %v3671_v39, %v1959_v46 }
 0x6c0   : > { %v3892_v1 = vsel %vm1970_vm11, %v3677_v44, 0.0  ;;  %v3895_v48 = vsel %vm1971_vm12, %v3671_v39, 0.0  ;;  %vm2177_vm11 = vcmask 1047561   ;;  %vm2183_vm12 = vcmask 1046536  }
 0x6c1   : > { %v2015_v43 = vrot.slane %v3892_v1, 1  ;;  %v2018_v20 = vrot.slane %v3895_v48, 1 }
 0x6c2   : > { %v1961_v16 = vpop.permute.xlu1 %1960 }
 0x6c3   : > { %vm1972_vm13 = vcmp.gt.f32.partialorder %v3610_v58, %v1961_v16  ;;  %vm1973_vm15 = vcmp.gt.f32.partialorder %v3608_v52, %v1961_v16 }
 0x6c4   : > { %v3900_v14 = vsel %vm1972_vm13, %v3610_v58, 0.0  ;;  %v3903_v10 = vsel %vm1973_vm15, %v3608_v52, 0.0  ;;  %vm2185_vm13 = vcmask 6144   ;;  %vm2325_vm15 = vcmask 7170  }
 0x6c5   : > { %v2016_v44 = vrot.slane %v3900_v14, 1  ;;  %v2019_v39 = vrot.slane %v3903_v10, 1 }
 0x6c6   : > { %v1965_v6 = vpop.permute.xlu1 %1964  ;;  %v1963_v19 = vpop.permute.xlu0 %1962 }
 0x6c7   : > { %v2017_v42 = vsel %vm677_vm2, %v2015_v43, %v2016_v44  ;;  %v2020_v35 = vsel %vm677_vm2, %v2018_v20, %v2019_v39  ;;  %vm1976_vm1 = vcmp.gt.f32.partialorder %v3694_v45, %v1965_v6  ;;  %vm1977_vm4 = vcmp.gt.f32.partialorder %v3687_v23, %v1965_v6 }
 0x6c8   : > { %2035 = vst.msk [vmem:[#allocation2] sm:$0xff] %vm941_vm6, %v2017_v42  ;;  %v1984_v52 = vsel %vm1976_vm1, %v3694_v45, 0.0  ;;  %v1985_v58 = vsel %vm1977_vm4, %v3687_v23, 0.0  ;;  %vm1974_vm8 = vcmp.gt.f32.partialorder %v3622_v4, %v1963_v19  ;;  %vm1975_vm9 = vcmp.gt.f32.partialorder %v3620_v3, %v1963_v19 }
 0x6c9   : > { %2036 = vst.msk [vmem:[#allocation2 + $0x8] sm:$0xff] %vm943_vm7, %v2020_v35  ;;  %v2025_v40 = vrot.slane %v1984_v52, 1  ;;  %v2027_v57 = vrot.slane %v1985_v58, 1  ;;  %v3920_v36 = vsel %vm1974_vm8, %v3622_v4, 0.0  ;;  %v3923_v5 = vsel %vm1975_vm9, %v3620_v3, 0.0 }
 0x6ca   : > { %v2021_v53 = vrot.slane %v3920_v36, 1  ;;  %v2023_v41 = vrot.slane %v3923_v5, 1  ;;  %vm2323_vm1 = vcmask 1047562   ;;  %vm2329_vm4 = vcmask 1045512  }
 0x6cb   : > { %vm2331_vm8 = vcmask 5120   ;;  %vm2471_vm9 = vcmask 7171  }
 0x6cc   : > { %v2022_v45 = vsel %vm677_vm2, %v2016_v44, %v2021_v53  ;;  %v2024_v23 = vsel %vm677_vm2, %v2019_v39, %v2023_v41  ;;  %v2026_v0 = vsel %vm677_vm2, %v2021_v53, %v2025_v40  ;;  %v2028_v33 = vsel %vm677_vm2, %v2023_v41, %v2027_v57 }
 0x6cd   : > { %2037 = vst.msk [vmem:[#allocation2 + $0x10] sm:$0xff] %vm941_vm6, %v2022_v45  ;;  %2039 = vst.msk [vmem:[#allocation2 + $0x20] sm:$0xff] %vm941_vm6, %v2026_v0 }
 0x6ce   : > { %2038 = vst.msk [vmem:[#allocation2 + $0x18] sm:$0xff] %vm943_vm7, %v2024_v23  ;;  %2040 = vst.msk [vmem:[#allocation2 + $0x28] sm:$0xff] %vm943_vm7, %v2028_v33 }
 0x6cf   : > { %v2047_v25 = vld [vmem:[#allocation2] sm:$0xfe] }
 0x6d0   : > { %v2048_v3 = vld [vmem:[#allocation2 + $0x8] sm:$0xfe]  ;;  %v2057_v56 = vrot.slane %v2047_v25, 1  ;;  %v2079_v59 = vld [vmem:[#allocation2] sm:$0xfc] }
 0x6d1   : > { %v2080_v22 = vld [vmem:[#allocation2 + $0x8] sm:$0xfc]  ;;  %v2060_v34 = vrot.slane %v2048_v3, 1  ;;  %v2041_v32 = vld [vmem:[#allocation2] sm:$0xff]  ;;  %v2087_v8 = vrot.slane %v2079_v59, 2 }
 0x6d2   : > { %v2042_v30 = vld [vmem:[#allocation2 + $0x8] sm:$0xff]  ;;  %v2090_v21 = vrot.slane %v2080_v22, 2 }
 0x6d4   : > { %v2049_v9 = vld [vmem:[#allocation2 + $0x20] sm:$0x7f]  ;;  %v2043_v31 = vld [vmem:[#allocation2 + $0x10] sm:$0xff] }
 0x6d5   : > { %v2050_v4 = vld [vmem:[#allocation2 + $0x28] sm:$0x7f]  ;;  %v2063_v49 = vrot.slane %v2049_v9, 1  ;;  %v2081_v61 = vld [vmem:[#allocation2 + $0x20] sm:$0xff]  ;;  %v2044_v63 = vld [vmem:[#allocation2 + $0x18] sm:$0xff]  ;;  %v2058_v38 = vrot.slane %v2043_v31, 1 }
 0x6d6   : > { %v2082_v15 = vld [vmem:[#allocation2 + $0x28] sm:$0xff]  ;;  %v2065_v51 = vrot.slane %v2050_v4, 1  ;;  %v2045_v18 = vld [vmem:[#allocation2 + $0x20] sm:$0x3f]  ;;  %v2061_v54 = vrot.slane %v2044_v63, 1  ;;  %v2093_v50 = vrot.slane %v2081_v61, 2 }
 0x6d7   : > { %v2046_v13 = vld [vmem:[#allocation2 + $0x28] sm:$0x3f]  ;;  %v2095_v7 = vrot.slane %v2082_v15, 2  ;;  %v2077_v29 = vmax.f32 %v2045_v18, %v2063_v49  ;;  %v2091_v17 = vrot.slane %v2044_v63, 2  ;;  %v2088_v24 = vrot.slane %v2043_v31, 2 }
 0x6d8   : > { %v2078_v12 = vmax.f32 %v2046_v13, %v2065_v51  ;;  %v2062_v60 = vsel %vm677_vm2, %v2060_v34, %v2061_v54  ;;  %v2059_v28 = vsel %vm677_vm2, %v2057_v56, %v2058_v38  ;;  %v2066_v27 = vsel %vm677_vm2, %v2061_v54, %v2065_v51 }
 0x6d9   : > { %v3936_v47 = vmax.f32 %v2077_v29, %v2093_v50  ;;  %v2074_v62 = vmax.f32 %v2042_v30, %v2062_v60  ;;  %v2073_v26 = vmax.f32 %v2041_v32, %v2059_v28  ;;  %v2064_v55 = vsel %vm677_vm2, %v2058_v38, %v2063_v49 }
 0x6da   : > { %v2108_v2 = vmax.f32 %v2078_v12, %v2095_v7  ;;  %v2092_v11 = vsel %vm630_vm0, %v2090_v21, %v2091_v17  ;;  %v2089_v46 = vsel %vm630_vm0, %v2087_v8, %v2088_v24  ;;  %v2076_v16 = vmax.f32 %v2044_v63, %v2066_v27 }
 0x6db   : > { %2123 = vrot.lane.b32.xlu0 %v3936_v47, %s3053_s9  ;;  %v2104_v37 = vmax.f32 %v2074_v62, %v2092_v11  ;;  %v2103_v43 = vmax.f32 %v2073_v26, %v2089_v46  ;;  %v2075_v20 = vmax.f32 %v2043_v31, %v2064_v55  ;;  %v2096_v44 = vsel %vm630_vm0, %v2091_v17, %v2095_v7 }
 0x6dc   : > { %2125 = vrot.lane.b32.xlu1 %v2108_v2, %s3053_s9  ;;  %v2106_v39 = vmax.f32 %v2076_v16, %v2096_v44  ;;  %v2094_v6 = vsel %vm630_vm0, %v2088_v24, %v2093_v50 }
 0x6dd   : > { %v2105_v19 = vmax.f32 %v2075_v20, %v2094_v6 }
 0x6df   : > { %2115 = vrot.lane.b32.xlu0 %v2103_v43, %s3053_s9 }
 0x6e0   : > { %2117 = vrot.lane.b32.xlu1 %v2104_v37, %s3053_s9 }
 0x6e3   : > { %2119 = vrot.lane.b32.xlu0 %v2105_v19, %s3053_s9 }
 0x6e4   : > { %2121 = vrot.lane.b32.xlu1 %v2106_v39, %s3053_s9 }
 0x6e7   : > { %2136 = vrot.lane.b32.xlu0 %v2103_v43, %s3051_s7 }
 0x6e8   : > { %2138 = vrot.lane.b32.xlu1 %v2104_v37, %s3051_s7 }
 0x6eb   : > { %2140 = vrot.lane.b32.xlu0 %v2105_v19, %s3051_s7 }
 0x6ec   : > { %2142 = vrot.lane.b32.xlu1 %v2106_v39, %s3051_s7 }
 0x6ef   : > { %2144 = vrot.lane.b32.xlu0 %v3936_v47, %s3051_s7 }
 0x6f0   : > { %2146 = vrot.lane.b32.xlu1 %v2108_v2, %s3051_s7 }
 0x74d   : > { %v2124_v35 = vpop.permute.xlu0 %2123 }
 0x74e   : > { %v2126_v42 = vpop.permute.xlu1 %2125 }
 0x74f   : > { %v2129_v13 = vsel %vm868_vm5, %v2124_v35, %v2126_v42 }
 0x750   : > { %v2135_v61 = vmax.f32 %v3936_v47, %v2129_v13 }
 0x751   : > { %v2116_v58 = vpop.permute.xlu0 %2115 }
 0x752   : > { %v2118_v52 = vpop.permute.xlu1 %2117 }
 0x753   : > { %v2127_v53 = vsel %vm868_vm5, %v2116_v58, %v2118_v52 }
 0x754   : > { %v2133_v45 = vmax.f32 %v2103_v43, %v2127_v53 }
 0x755   : > { %v2120_v57 = vpop.permute.xlu0 %2119 }
 0x756   : > { %v2122_v40 = vpop.permute.xlu1 %2121 }
 0x757   : > { %v2128_v0 = vsel %vm868_vm5, %v2120_v57, %v2122_v40 }
 0x758   : > { %v2134_v15 = vmax.f32 %v2105_v19, %v2128_v0 }
 0x759   : > { %v2137_v23 = vpop.permute.xlu0 %2136 }
 0x75a   : > { %v2139_v41 = vpop.permute.xlu1 %2138 }
 0x75b   : > { %v2148_v33 = vsel %vm815_vm3, %v2137_v23, %v2139_v41 }
 0x75c   : > { %v2154_v3 = vmax.f32 %v2133_v45, %v2148_v33 }
 0x75d   : > { %v2141_v25 = vpop.permute.xlu0 %2140 }
 0x75e   : > { %v2143_v4 = vpop.permute.xlu1 %2142  ;;  %2157 = vst [vmem:[%s482_s15 - $0x3] sm:$0xf8] %v2154_v3  ;;  %v2163_v22 = vrot.slane %v2154_v3, 7 }
 0x75f   : > { %v2149_v51 = vsel %vm815_vm3, %v2141_v25, %v2143_v4 }
 0x760   : > { %v2155_v9 = vmax.f32 %v2134_v15, %v2149_v51  ;;  %2168 = vrot.lane.b32.xlu0 %v2163_v22, %s3054_s10 }
 0x761   : > { %v2145_v34 = vpop.permute.xlu0 %2144 }
 0x762   : > { %v2147_v49 = vpop.permute.xlu1 %2146  ;;  %2158 = vst [vmem:[%s482_s15 + $0x5] sm:$0xff] %v2155_v9  ;;  %v2164_v63 = vrot.slane %v2155_v9, 7 }
 0x763   : > { %v2150_v31 = vsel %vm815_vm3, %v2145_v34, %v2147_v49 }
 0x764   : > { %v2156_v12 = vmax.f32 %v2135_v61, %v2150_v31  ;;  %v2165_v7 = vsel %vm1741_vm10, %v2163_v22, %v2164_v63 }
 0x765   : > { %2170 = vrot.lane.b32.xlu1 %v2165_v7, %s3054_s10 }
 0x766   : > { %2159 = vst [vmem:[%s482_s15 + $0xd] sm:$0x7] %v2156_v12  ;;  %v2166_v18 = vrot.slane %v2156_v12, 7 }
 0x768   : > { %v2167_v54 = vsel %vm1741_vm10, %v2164_v63, %v2166_v18 }
 0x769   : > { %2172 = vrot.lane.b32.xlu0 %v2167_v54, %s3054_s10 }
 0x7d2   : > { %v2169_v56 = vpop.permute.xlu0 %2168 }
 0x7d3   : > { %2180 = vst.msk [vmem:[#allocation2 + $0x8] sm:$0xfe] %vm2179_vm14, %v2169_v56  ;;  %vm2469_vm14 = vcmask 1047563  }
 0x7d4   : > { %2178 = vst.msk [vmem:[#allocation2] sm:$0xfe] %vm2177_vm11, %v2169_v56  ;;  %vm2477_vm11 = vcmask 4096  }
 0x7d7   : > { %v2171_v29 = vpop.permute.xlu1 %2170 }
 0x7d8   : > { %2181 = vst.msk [vmem:[#allocation2 + $0x10] sm:$0xff] %vm941_vm6, %v2171_v29 }
 0x7d9   : > { %2182 = vst.msk [vmem:[#allocation2 + $0x18] sm:$0xff] %vm943_vm7, %v2171_v29 }
 0x7da   : > { %v2194_v59 = vld [vmem:[#allocation2 + $0x8] sm:$0xfc] }
 0x7db   : > { %v2173_v50 = vpop.permute.xlu0 %2172  ;;  %v2193_v30 = vld [vmem:[#allocation2] sm:$0xfc]  ;;  %v2206_v47 = vrot.slane %v2194_v59, 1  ;;  %v2226_v16 = vld [vmem:[#allocation2 + $0x8] sm:$0xf8] }
 0x7dc   : > { %2184 = vst.msk [vmem:[#allocation2 + $0x20] sm:$0x7f] %vm2183_vm12, %v2173_v50  ;;  %v2203_v28 = vrot.slane %v2193_v30, 1  ;;  %v2188_v39 = vld [vmem:[#allocation2 + $0x8] sm:$0xfe]  ;;  %v2236_v57 = vrot.slane %v2226_v16, 2 }
 0x7dd   : > { %2186 = vst.msk [vmem:[#allocation2 + $0x28] sm:$0x7f] %vm2185_vm13, %v2173_v50  ;;  %v2225_v19 = vld [vmem:[#allocation2] sm:$0xf8] }
 0x7de   : > { %v2187_v52 = vld [vmem:[#allocation2] sm:$0xfe]  ;;  %v2233_v45 = vrot.slane %v2225_v19, 2 }
 0x7df   : > { %v2189_v38 = vld [vmem:[#allocation2 + $0x10] sm:$0xff] }
 0x7e0   : > { %v2190_v17 = vld [vmem:[#allocation2 + $0x18] sm:$0xff]  ;;  %v2204_v60 = vrot.slane %v2189_v38, 1  ;;  %v2234_v58 = vrot.slane %v2189_v38, 2 }
 0x7e1   : > { %v2207_v2 = vrot.slane %v2190_v17, 1  ;;  %v2237_v6 = vrot.slane %v2190_v17, 2 }
 0x7e2   : > { %v2205_v43 = vsel %vm677_vm2, %v2203_v28, %v2204_v60  ;;  %v2235_v3 = vsel %vm630_vm0, %v2233_v45, %v2234_v58 }
 0x7e3   : > { %v2195_v32 = vld [vmem:[#allocation2 + $0x20] sm:$0x3f]  ;;  %v2208_v55 = vsel %vm677_vm2, %v2206_v47, %v2207_v2  ;;  %v2219_v53 = vmax.f32 %v2187_v52, %v2205_v43  ;;  %v2238_v0 = vsel %vm630_vm0, %v2236_v57, %v2237_v6 }
 0x7e4   : > { %v2196_v21 = vld [vmem:[#allocation2 + $0x28] sm:$0x3f]  ;;  %v2209_v26 = vrot.slane %v2195_v32, 1  ;;  %v2227_v8 = vld [vmem:[#allocation2 + $0x20] sm:$0x7f]  ;;  %v2220_v35 = vmax.f32 %v2188_v39, %v2208_v55 }
 0x7e5   : > { %v2228_v24 = vld [vmem:[#allocation2 + $0x28] sm:$0x7f]  ;;  %v2211_v62 = vrot.slane %v2196_v21, 1  ;;  %v2191_v46 = vld [vmem:[#allocation2 + $0x20] sm:$0x1f]  ;;  %v2239_v44 = vrot.slane %v2227_v8, 2  ;;  %v2249_v15 = vmax.f32 %v2219_v53, %v2235_v3 }
 0x7e6   : > { %v2192_v27 = vld [vmem:[#allocation2 + $0x28] sm:$0x1f]  ;;  %v2241_v37 = vrot.slane %v2228_v24, 2  ;;  %v2223_v20 = vmax.f32 %v2191_v46, %v2209_v26  ;;  %v2210_v23 = vsel %vm677_vm2, %v2204_v60, %v2209_v26  ;;  %v2250_v33 = vmax.f32 %v2220_v35, %v2238_v0 }
 0x7e7   : > { %v2224_v11 = vmax.f32 %v2192_v27, %v2211_v62  ;;  %v2212_v41 = vsel %vm677_vm2, %v2207_v2, %v2211_v62  ;;  %v2221_v22 = vmax.f32 %v2189_v38, %v2210_v23  ;;  %v2240_v51 = vsel %vm630_vm0, %v2234_v58, %v2239_v44 }
 0x7e8   : > { %v2253_v40 = vmax.f32 %v2223_v20, %v2239_v44  ;;  %v2222_v4 = vmax.f32 %v2190_v17, %v2212_v41  ;;  %v2242_v25 = vsel %vm630_vm0, %v2237_v6, %v2241_v37 }
 0x7e9   : > { %v2254_v42 = vmax.f32 %v2224_v11, %v2241_v37  ;;  %v2251_v9 = vmax.f32 %v2221_v22, %v2240_v51 }
 0x7ea   : > { %2269 = vrot.lane.b32.xlu1 %v2253_v40, %s3053_s9  ;;  %v2252_v13 = vmax.f32 %v2222_v4, %v2242_v25 }
 0x7eb   : > { %2271 = vrot.lane.b32.xlu0 %v2254_v42, %s3053_s9 }
 0x7ee   : > { %2261 = vrot.lane.b32.xlu1 %v2249_v15, %s3053_s9 }
 0x7ef   : > { %2263 = vrot.lane.b32.xlu0 %v2250_v33, %s3053_s9 }
 0x7f2   : > { %2265 = vrot.lane.b32.xlu1 %v2251_v9, %s3053_s9 }
 0x7f3   : > { %2267 = vrot.lane.b32.xlu0 %v2252_v13, %s3053_s9 }
 0x7f6   : > { %2282 = vrot.lane.b32.xlu1 %v2249_v15, %s3051_s7 }
 0x7f7   : > { %2284 = vrot.lane.b32.xlu0 %v2250_v33, %s3051_s7 }
 0x7fa   : > { %2286 = vrot.lane.b32.xlu1 %v2251_v9, %s3051_s7 }
 0x7fb   : > { %2288 = vrot.lane.b32.xlu0 %v2252_v13, %s3051_s7 }
 0x7fe   : > { %2290 = vrot.lane.b32.xlu1 %v2253_v40, %s3051_s7 }
 0x7ff   : > { %2292 = vrot.lane.b32.xlu0 %v2254_v42, %s3051_s7 }
 0x85c   : > { %v2270_v61 = vpop.permute.xlu1 %2269 }
 0x85d   : > { %v2272_v49 = vpop.permute.xlu0 %2271 }
 0x85e   : > { %v2275_v60 = vsel %vm868_vm5, %v2270_v61, %v2272_v49 }
 0x85f   : > { %v2281_v62 = vmax.f32 %v2253_v40, %v2275_v60 }
 0x860   : > { %v2262_v34 = vpop.permute.xlu1 %2261 }
 0x861   : > { %v2264_v63 = vpop.permute.xlu0 %2263 }
 0x862   : > { %v2273_v7 = vsel %vm868_vm5, %v2262_v34, %v2264_v63 }
 0x863   : > { %v2279_v54 = vmax.f32 %v2249_v15, %v2273_v7 }
 0x864   : > { %v2266_v12 = vpop.permute.xlu1 %2265 }
 0x865   : > { %v2268_v31 = vpop.permute.xlu0 %2267 }
 0x866   : > { %v2274_v29 = vsel %vm868_vm5, %v2266_v12, %v2268_v31 }
 0x867   : > { %v2280_v59 = vmax.f32 %v2251_v9, %v2274_v29 }
 0x868   : > { %v2283_v56 = vpop.permute.xlu1 %2282 }
 0x869   : > { %v2285_v18 = vpop.permute.xlu0 %2284 }
 0x86a   : > { %v2294_v50 = vsel %vm815_vm3, %v2283_v56, %v2285_v18 }
 0x86b   : > { %v2300_v17 = vmax.f32 %v2279_v54, %v2294_v50 }
 0x86c   : > { %v2287_v30 = vpop.permute.xlu1 %2286 }
 0x86d   : > { %v2289_v38 = vpop.permute.xlu0 %2288  ;;  %2303 = vst [vmem:[%s492_s17 - $0x3] sm:$0xf8] %v2300_v17  ;;  %v2309_v2 = vrot.slane %v2300_v17, 7 }
 0x86e   : > { %v2295_v21 = vsel %vm815_vm3, %v2287_v30, %v2289_v38 }
 0x86f   : > { %v2301_v24 = vmax.f32 %v2280_v59, %v2295_v21  ;;  %2314 = vrot.lane.b32.xlu1 %v2309_v2, %s3054_s10 }
 0x870   : > { %v2291_v28 = vpop.permute.xlu1 %2290 }
 0x871   : > { %v2293_v47 = vpop.permute.xlu0 %2292  ;;  %2304 = vst [vmem:[%s492_s17 + $0x5] sm:$0xff] %v2301_v24  ;;  %v2310_v32 = vrot.slane %v2301_v24, 7 }
 0x872   : > { %v2296_v27 = vsel %vm815_vm3, %v2291_v28, %v2293_v47 }
 0x873   : > { %v2302_v26 = vmax.f32 %v2281_v62, %v2296_v27  ;;  %v2311_v8 = vsel %vm1741_vm10, %v2309_v2, %v2310_v32 }
 0x874   : > { %2316 = vrot.lane.b32.xlu0 %v2311_v8, %s3054_s10 }
 0x875   : > { %2305 = vst [vmem:[%s492_s17 + $0xd] sm:$0x7] %v2302_v26  ;;  %v2312_v55 = vrot.slane %v2302_v26, 7 }
 0x877   : > { %v2313_v11 = vsel %vm1741_vm10, %v2310_v32, %v2312_v55 }
 0x878   : > { %2318 = vrot.lane.b32.xlu1 %v2313_v11, %s3054_s10 }
 0x8e1   : > { %v2315_v37 = vpop.permute.xlu1 %2314 }
 0x8e2   : > { %2326 = vst.msk [vmem:[#allocation2 + $0x8] sm:$0xfc] %vm2325_vm15, %v2315_v37 }
 0x8e3   : > { %2324 = vst.msk [vmem:[#allocation2] sm:$0xfc] %vm2323_vm1, %v2315_v37 }
 0x8e6   : > { %v2317_v46 = vpop.permute.xlu0 %2316 }
 0x8e7   : > { %2327 = vst.msk [vmem:[#allocation2 + $0x10] sm:$0xff] %vm941_vm6, %v2317_v46 }
 0x8e8   : > { %2328 = vst.msk [vmem:[#allocation2 + $0x18] sm:$0xff] %vm943_vm7, %v2317_v46 }
 0x8e9   : > { %v2340_v44 = vld [vmem:[#allocation2 + $0x8] sm:$0xf8] }
 0x8ea   : > { %v2319_v16 = vpop.permute.xlu1 %2318  ;;  %v2339_v6 = vld [vmem:[#allocation2] sm:$0xf8]  ;;  %v2352_v52 = vrot.slane %v2340_v44, 1  ;;  %v2372_v4 = vld [vmem:[#allocation2 + $0x8] sm:$0xf0] }
 0x8eb   : > { %2330 = vst.msk [vmem:[#allocation2 + $0x20] sm:$0x3f] %vm2329_vm4, %v2319_v16  ;;  %v2349_v57 = vrot.slane %v2339_v6, 1  ;;  %v2334_v13 = vld [vmem:[#allocation2 + $0x8] sm:$0xfc]  ;;  %v2382_v12 = vrot.slane %v2372_v4, 2 }
 0x8ec   : > { %2332 = vst.msk [vmem:[#allocation2 + $0x28] sm:$0x3f] %vm2331_vm8, %v2319_v16  ;;  %v2371_v9 = vld [vmem:[#allocation2] sm:$0xf0] }
 0x8ed   : > { %v2333_v63 = vld [vmem:[#allocation2] sm:$0xfc]  ;;  %v2379_v54 = vrot.slane %v2371_v9, 2 }
 0x8ee   : > { %v2335_v20 = vld [vmem:[#allocation2 + $0x10] sm:$0xff] }
 0x8ef   : > { %v2336_v43 = vld [vmem:[#allocation2 + $0x18] sm:$0xff]  ;;  %v2350_v19 = vrot.slane %v2335_v20, 1  ;;  %v2380_v34 = vrot.slane %v2335_v20, 2 }
 0x8f0   : > { %v2353_v39 = vrot.slane %v2336_v43, 1  ;;  %v2383_v51 = vrot.slane %v2336_v43, 2 }
 0x8f1   : > { %v2351_v15 = vsel %vm677_vm2, %v2349_v57, %v2350_v19  ;;  %v2381_v17 = vsel %vm630_vm0, %v2379_v54, %v2380_v34 }
 0x8f2   : > { %v2341_v40 = vld [vmem:[#allocation2 + $0x20] sm:$0x1f]  ;;  %v2354_v23 = vsel %vm677_vm2, %v2352_v52, %v2353_v39  ;;  %v2365_v7 = vmax.f32 %v2333_v63, %v2351_v15  ;;  %v2384_v29 = vsel %vm630_vm0, %v2382_v12, %v2383_v51 }
 0x8f3   : > { %v2342_v42 = vld [vmem:[#allocation2 + $0x28] sm:$0x1f]  ;;  %v2355_v41 = vrot.slane %v2341_v40, 1  ;;  %v2373_v45 = vld [vmem:[#allocation2 + $0x20] sm:$0x3f]  ;;  %v2366_v61 = vmax.f32 %v2334_v13, %v2354_v23 }
 0x8f4   : > { %v2374_v35 = vld [vmem:[#allocation2 + $0x28] sm:$0x3f]  ;;  %v2357_v58 = vrot.slane %v2342_v42, 1  ;;  %v2337_v3 = vld [vmem:[#allocation2 + $0x20] sm:$0xf]  ;;  %v2385_v25 = vrot.slane %v2373_v45, 2  ;;  %v2395_v59 = vmax.f32 %v2365_v7, %v2381_v17 }
 0x8f5   : > { %v2338_v53 = vld [vmem:[#allocation2 + $0x28] sm:$0xf]  ;;  %v2387_v33 = vrot.slane %v2374_v35, 2  ;;  %v2369_v22 = vmax.f32 %v2337_v3, %v2355_v41  ;;  %v2356_v56 = vsel %vm677_vm2, %v2350_v19, %v2355_v41  ;;  %v2396_v50 = vmax.f32 %v2366_v61, %v2384_v29 }
 0x8f6   : > { %v2370_v0 = vmax.f32 %v2338_v53, %v2357_v58  ;;  %v2358_v18 = vsel %vm677_vm2, %v2353_v39, %v2357_v58  ;;  %v2367_v2 = vmax.f32 %v2335_v20, %v2356_v56  ;;  %v2386_v21 = vsel %vm630_vm0, %v2380_v34, %v2385_v25 }
 0x8f7   : > { %v2399_v31 = vmax.f32 %v2369_v22, %v2385_v25  ;;  %v2368_v38 = vmax.f32 %v2336_v43, %v2358_v18  ;;  %v2388_v30 = vsel %vm630_vm0, %v2383_v51, %v2387_v33 }
 0x8f8   : > { %v2400_v49 = vmax.f32 %v2370_v0, %v2387_v33  ;;  %v2397_v24 = vmax.f32 %v2367_v2, %v2386_v21 }
 0x8f9   : > { %2415 = vrot.lane.b32.xlu0 %v2399_v31, %s3053_s9  ;;  %v2398_v60 = vmax.f32 %v2368_v38, %v2388_v30 }
 0x8fa   : > { %2417 = vrot.lane.b32.xlu1 %v2400_v49, %s3053_s9 }
 0x8fd   : > { %2407 = vrot.lane.b32.xlu0 %v2395_v59, %s3053_s9 }
 0x8fe   : > { %2409 = vrot.lane.b32.xlu1 %v2396_v50, %s3053_s9 }
 0x901   : > { %2411 = vrot.lane.b32.xlu0 %v2397_v24, %s3053_s9 }
 0x902   : > { %2413 = vrot.lane.b32.xlu1 %v2398_v60, %s3053_s9 }
 0x905   : > { %2428 = vrot.lane.b32.xlu0 %v2395_v59, %s3051_s7 }
 0x906   : > { %2430 = vrot.lane.b32.xlu1 %v2396_v50, %s3051_s7 }
 0x909   : > { %2432 = vrot.lane.b32.xlu0 %v2397_v24, %s3051_s7 }
 0x90a   : > { %2434 = vrot.lane.b32.xlu1 %v2398_v60, %s3051_s7 }
 0x90d   : > { %2436 = vrot.lane.b32.xlu0 %v2399_v31, %s3051_s7 }
 0x90e   : > { %2438 = vrot.lane.b32.xlu1 %v2400_v49, %s3051_s7 }
 0x96b   : > { %v2416_v62 = vpop.permute.xlu0 %2415 }
 0x96c   : > { %v2418_v47 = vpop.permute.xlu1 %2417 }
 0x96d   : > { %v2421_v19 = vsel %vm868_vm5, %v2416_v62, %v2418_v47 }
 0x96e   : > { %v2427_v58 = vmax.f32 %v2399_v31, %v2421_v19 }
 0x96f   : > { %v2408_v28 = vpop.permute.xlu0 %2407 }
 0x970   : > { %v2410_v32 = vpop.permute.xlu1 %2409 }
 0x971   : > { %v2419_v8 = vsel %vm868_vm5, %v2408_v28, %v2410_v32 }
 0x972   : > { %v2425_v11 = vmax.f32 %v2395_v59, %v2419_v8 }
 0x973   : > { %v2412_v26 = vpop.permute.xlu0 %2411 }
 0x974   : > { %v2414_v27 = vpop.permute.xlu1 %2413 }
 0x975   : > { %v2420_v46 = vsel %vm868_vm5, %v2412_v26, %v2414_v27 }
 0x976   : > { %v2426_v44 = vmax.f32 %v2397_v24, %v2420_v46 }
 0x977   : > { %v2429_v37 = vpop.permute.xlu0 %2428 }
 0x978   : > { %v2431_v55 = vpop.permute.xlu1 %2430 }
 0x979   : > { %v2440_v16 = vsel %vm815_vm3, %v2429_v37, %v2431_v55 }
 0x97a   : > { %v2446_v43 = vmax.f32 %v2425_v11, %v2440_v16 }
 0x97b   : > { %v2433_v6 = vpop.permute.xlu0 %2432 }
 0x97c   : > { %v2435_v20 = vpop.permute.xlu1 %2434  ;;  %2449 = vst [vmem:[%s502_s20 - $0x3] sm:$0xf8] %v2446_v43  ;;  %v2455_v39 = vrot.slane %v2446_v43, 7 }
 0x97d   : > { %v2441_v42 = vsel %vm815_vm3, %v2433_v6, %v2435_v20 }
 0x97e   : > { %v2447_v35 = vmax.f32 %v2426_v44, %v2441_v42  ;;  %2460 = vrot.lane.b32.xlu0 %v2455_v39, %s3054_s10 }
 0x97f   : > { %v2437_v57 = vpop.permute.xlu0 %2436 }
 0x980   : > { %v2439_v52 = vpop.permute.xlu1 %2438  ;;  %2450 = vst [vmem:[%s502_s20 + $0x5] sm:$0xff] %v2447_v35  ;;  %v2456_v40 = vrot.slane %v2447_v35, 7 }
 0x981   : > { %v2442_v53 = vsel %vm815_vm3, %v2437_v57, %v2439_v52 }
 0x982   : > { %v2448_v41 = vmax.f32 %v2427_v58, %v2442_v53  ;;  %v2457_v45 = vsel %vm1741_vm10, %v2455_v39, %v2456_v40 }
 0x983   : > { %2462 = vrot.lane.b32.xlu1 %v2457_v45, %s3054_s10 }
 0x984   : > { %2451 = vst [vmem:[%s502_s20 + $0xd] sm:$0x7] %v2448_v41  ;;  %v2458_v23 = vrot.slane %v2448_v41, 7 }
 0x986   : > { %v2459_v0 = vsel %vm1741_vm10, %v2456_v40, %v2458_v23  ;;  %vm2475_vm10 = vcmask 1044488  }
 0x987   : > { %1992 = vrot.lane.b32.xlu1 %v3892_v1, %s3053_s9  ;;  %2464 = vrot.lane.b32.xlu0 %v2459_v0, %s3054_s10  ;;  %s512_s10 = scalar_lea.vmem %s4130_s6, %s3962_s12 }
 0x98b   : > { %1996 = vrot.lane.b32.xlu1 %v3900_v14, %s3053_s9  ;;  %1994 = vrot.lane.b32.xlu0 %v3895_v48, %s3053_s9 }
 0x98f   : > { %1998 = vrot.lane.b32.xlu0 %v3903_v10, %s3053_s9 }
 0x9f0   : > { %v2461_v33 = vpop.permute.xlu0 %2460 }
 0x9f1   : > { %2472 = vst.msk [vmem:[#allocation2 + $0x8] sm:$0xf8] %vm2471_vm9, %v2461_v33 }
 0x9f2   : > { %2470 = vst.msk [vmem:[#allocation2] sm:$0xf8] %vm2469_vm14, %v2461_v33 }
 0x9f5   : > { %v2463_v3 = vpop.permute.xlu1 %2462 }
 0x9f6   : > { %2473 = vst.msk [vmem:[#allocation2 + $0x10] sm:$0xff] %vm941_vm6, %v2463_v3 }
 0x9f7   : > { %2474 = vst.msk [vmem:[#allocation2 + $0x18] sm:$0xff] %vm943_vm7, %v2463_v3 }
 0x9f8   : > { %v2486_v15 = vld [vmem:[#allocation2 + $0x8] sm:$0xf0] }
 0x9f9   : > { %v2465_v1 = vpop.permute.xlu0 %2464  ;;  %v1993_v48 = vpop.permute.xlu1 %1992  ;;  %v2485_v34 = vld [vmem:[#allocation2] sm:$0xf0]  ;;  %v2498_v59 = vrot.slane %v2486_v15, 1  ;;  %v2518_v24 = vld [vmem:[#allocation2 + $0x8] sm:$0xe0] }
 0x9fa   : > { %2476 = vst.msk [vmem:[#allocation2 + $0x20] sm:$0x1f] %vm2475_vm10, %v2465_v1  ;;  %v2495_v30 = vrot.slane %v2485_v34, 1  ;;  %v2480_v62 = vld [vmem:[#allocation2 + $0x8] sm:$0xf8]  ;;  %v2528_v55 = vrot.slane %v2518_v24, 2 }
 0x9fb   : > { %2478 = vst.msk [vmem:[#allocation2 + $0x28] sm:$0x1f] %vm2477_vm11, %v2465_v1  ;;  %v2517_v28 = vld [vmem:[#allocation2] sm:$0xe0] }
 0x9fc   : > { %v2479_v26 = vld [vmem:[#allocation2] sm:$0xf8]  ;;  %v2525_v46 = vrot.slane %v2517_v28, 2 }
 0x9fd   : > { %v1995_v14 = vpop.permute.xlu0 %1994  ;;  %v1997_v22 = vpop.permute.xlu1 %1996  ;;  %v2481_v9 = vld [vmem:[#allocation2 + $0x10] sm:$0xff] }
 0x9fe   : > { %v2004_v10 = vsel %vm868_vm5, %v1993_v48, %v1995_v14  ;;  %v2482_v4 = vld [vmem:[#allocation2 + $0x18] sm:$0xff]  ;;  %v2496_v50 = vrot.slane %v2481_v9, 1  ;;  %v2526_v8 = vrot.slane %v2481_v9, 2 }
 0x9ff   : > { %2010 = vst [vmem:[%s4067_s29 - $0x5] sm:$0xe0] %v2004_v10  ;;  %v2499_v18 = vrot.slane %v2482_v4, 1  ;;  %v2529_v32 = vrot.slane %v2482_v4, 2 }
 0xa00   : > { %v2497_v47 = vsel %vm677_vm2, %v2495_v30, %v2496_v50  ;;  %v2527_v44 = vsel %vm630_vm0, %v2525_v46, %v2526_v8 }
 0xa01   : > { %v1999_v25 = vpop.permute.xlu0 %1998  ;;  %v2487_v63 = vld [vmem:[#allocation2 + $0x20] sm:$0xf]  ;;  %v2500_v21 = vsel %vm677_vm2, %v2498_v59, %v2499_v18  ;;  %v2511_v11 = vmax.f32 %v2479_v26, %v2497_v47  ;;  %v2530_v43 = vsel %vm630_vm0, %v2528_v55, %v2529_v32 }
 0xa02   : > { %v2488_v13 = vld [vmem:[#allocation2 + $0x28] sm:$0xf]  ;;  %v2005_v49 = vsel %vm868_vm5, %v1997_v22, %v1999_v25  ;;  %v2501_v12 = vrot.slane %v2487_v63, 1  ;;  %v2519_v7 = vld [vmem:[#allocation2 + $0x20] sm:$0x1f]  ;;  %v2512_v27 = vmax.f32 %v2480_v62, %v2500_v21 }
 0xa03   : > { %v2520_v51 = vld [vmem:[#allocation2 + $0x28] sm:$0x1f]  ;;  %v2503_v61 = vrot.slane %v2488_v13, 1  ;;  %2011 = vst [vmem:[%s4067_s29 + $0x3] sm:$0xff] %v2005_v49  ;;  %v2483_v29 = vld [vmem:[#allocation2 + $0x20] sm:$0x7]  ;;  %v2541_v6 = vmax.f32 %v2511_v11, %v2527_v44 }
 0xa04   : > { %v2484_v31 = vld [vmem:[#allocation2 + $0x28] sm:$0x7]  ;;  %v2533_v56 = vrot.slane %v2520_v51, 2  ;;  %v2515_v17 = vmax.f32 %v2483_v29, %v2501_v12  ;;  %v2531_v38 = vrot.slane %v2519_v7, 2  ;;  %v2502_v16 = vsel %vm677_vm2, %v2496_v50, %v2501_v12 }
 0xa05   : > { %v2516_v54 = vmax.f32 %v2484_v31, %v2503_v61  ;;  %v2504_v37 = vsel %vm677_vm2, %v2499_v18, %v2503_v61  ;;  %v2542_v20 = vmax.f32 %v2512_v27, %v2530_v43  ;;  %v2513_v19 = vmax.f32 %v2481_v9, %v2502_v16 }
 0xa06   : > { %v2545_v60 = vmax.f32 %v2515_v17, %v2531_v38  ;;  %v2514_v39 = vmax.f32 %v2482_v4, %v2504_v37  ;;  %v2534_v42 = vsel %vm630_vm0, %v2529_v32, %v2533_v56  ;;  %v2532_v52 = vsel %vm630_vm0, %v2526_v8, %v2531_v38 }
 0xa07   : > { %v2546_v2 = vmax.f32 %v2516_v54, %v2533_v56  ;;  %v2543_v58 = vmax.f32 %v2513_v19, %v2532_v52 }
 0xa08   : > { %2561 = vrot.lane.b32.xlu1 %v2545_v60, %s3053_s9  ;;  %v2544_v35 = vmax.f32 %v2514_v39, %v2534_v42 }
 0xa09   : > { %2563 = vrot.lane.b32.xlu0 %v2546_v2, %s3053_s9 }
 0xa0c   : > { %2582 = vrot.lane.b32.xlu1 %v2545_v60, %s3051_s7 }
 0xa0d   : > { %2584 = vrot.lane.b32.xlu0 %v2546_v2, %s3051_s7 }
 0xa10   : > { %2553 = vrot.lane.b32.xlu1 %v2541_v6, %s3053_s9 }
 0xa11   : > { %2555 = vrot.lane.b32.xlu0 %v2542_v20, %s3053_s9 }
 0xa14   : > { %2557 = vrot.lane.b32.xlu1 %v2543_v58, %s3053_s9 }
 0xa15   : > { %2559 = vrot.lane.b32.xlu0 %v2544_v35, %s3053_s9 }
 0xa18   : > { %2574 = vrot.lane.b32.xlu1 %v2541_v6, %s3051_s7 }
 0xa19   : > { %2576 = vrot.lane.b32.xlu0 %v2542_v20, %s3051_s7 }
 0xa1c   : > { %2578 = vrot.lane.b32.xlu1 %v2543_v58, %s3051_s7 }
 0xa1d   : > { %2580 = vrot.lane.b32.xlu0 %v2544_v35, %s3051_s7 }
 0xa20   : > { %2000 = vrot.lane.b32.xlu1 %v3920_v36, %s3053_s9 }
 0xa21   : > { %2002 = vrot.lane.b32.xlu0 %v3923_v5, %s3053_s9 }
 0xa7a   : > { %v2562_v57 = vpop.permute.xlu1 %2561 }
 0xa7b   : > { %v2564_v40 = vpop.permute.xlu0 %2563 }
 0xa7c   : > { %v2567_v53 = vsel %vm868_vm5, %v2562_v57, %v2564_v40 }
 0xa7d   : > { %v2573_v45 = vmax.f32 %v2545_v60, %v2567_v53 }
 0xa7e   : > { %v2583_v23 = vpop.permute.xlu1 %2582 }
 0xa7f   : > { %v2585_v41 = vpop.permute.xlu0 %2584 }
 0xa80   : > { %v2588_v0 = vsel %vm815_vm3, %v2583_v23, %v2585_v41 }
 0xa81   : > { %v2594_v33 = vmax.f32 %v2573_v45, %v2588_v0 }
 0xa82   : > { %v2554_v5 = vpop.permute.xlu1 %2553 }
 0xa83   : > { %v2556_v3 = vpop.permute.xlu0 %2555  ;;  %2597 = vst [vmem:[%s512_s10 + $0xd] sm:$0x7] %v2594_v33 }
 0xa84   : > { %v2565_v36 = vsel %vm868_vm5, %v2554_v5, %v2556_v3 }
 0xa85   : > { %v2571_v10 = vmax.f32 %v2541_v6, %v2565_v36 }
 0xa86   : > { %v2558_v48 = vpop.permute.xlu1 %2557 }
 0xa87   : > { %v2560_v1 = vpop.permute.xlu0 %2559 }
 0xa88   : > { %v2566_v15 = vsel %vm868_vm5, %v2558_v48, %v2560_v1 }
 0xa89   : > { %v2572_v51 = vmax.f32 %v2543_v58, %v2566_v15 }
 0xa8a   : > { %v2575_v4 = vpop.permute.xlu1 %2574 }
 0xa8b   : > { %v2577_v14 = vpop.permute.xlu0 %2576 }
 0xa8c   : > { %v2586_v22 = vsel %vm815_vm3, %v2575_v4, %v2577_v14 }
 0xa8d   : > { %v2592_v25 = vmax.f32 %v2571_v10, %v2586_v22 }
 0xa8e   : > { %v2579_v9 = vpop.permute.xlu1 %2578 }
 0xa8f   : > { %v2581_v13 = vpop.permute.xlu0 %2580  ;;  %2595 = vst [vmem:[%s512_s10 - $0x3] sm:$0xf8] %v2592_v25 }
 0xa90   : > { %v2587_v49 = vsel %vm815_vm3, %v2579_v9, %v2581_v13 }
 0xa91   : > { %v2593_v61 = vmax.f32 %v2572_v51, %v2587_v49 }
 0xa92   : > { %v2001_v34 = vpop.permute.xlu1 %2000 }
 0xa93   : > { %v2003_v63 = vpop.permute.xlu0 %2002  ;;  %2596 = vst [vmem:[%s512_s10 + $0x5] sm:$0xff] %v2593_v61 }
 0xa94   : > { %v2006_v31 = vsel %vm868_vm5, %v2001_v34, %v2003_v63 }
 0xa95   : > { %2012 = vst [vmem:[%s4067_s29 + $0xb] sm:$0x1f] %v2006_v31 }
 0xa96 PF: > { %s17_s25 = sadd.s32 1, %s3048_s25   ;;  %s4134_s21 = smov %s3036_s22 }
 0xa97   : > { %p14_p10 = scmp.ge.s32.totalorder %s17_s25, 4   ;;  %s4135_s22 = smov %s3130_s30 }
 0xa98   : > { %s4136_s23 = smov %s3044_s24  ;;  %s4137_s24 = smov %s4139_s26 }
 0xa99   :  { %16 = sbr.rel (!%p14_p10) target bundleno = 3 (0x3), region = 207 }

</bundles_post_ra>
